<compile_context>
chip_gen: v5e
topology: v5e:2x2
jax: 0.10.0
libtpu: 0.0.40
codegen_flags: <defaults>
</compile_context>

<pallas_src>
import jax
import jax.numpy as jnp
from jax.experimental import pallas as pl
from jax.experimental.pallas import tpu as pltpu

BLOCKS = 3
FILTERS = 16
KERNEL_SIZE = 1   # conv1 kernel size (with padding=1 -> feature map is (n+2) x (n+2))


# ----------------------------------------------------------------------------
# Pallas kernel (per-image): conv1 -> 3 residual blocks -> policy / value heads
# ----------------------------------------------------------------------------
def _make_kernel(rolls):
    """rolls[t] is the static lane-roll amount for 3x3 tap t (row-major taps)."""

    def kernel(x_ref, m_ref, w1_ref, b1_ref, wres_ref, bres_ref,
               whead_ref, bhead_ref, wfc0_ref, wfc1_ref, bfc_ref,
               wv1_ref, bv1_ref, wv2_ref, bv2_ref, pi_ref, v_ref):
        f32 = jnp.float32
        x = x_ref[0]                     # (Cin, P)  -- spatially zero-padded in the wrapper
        masks = m_ref[...]               # (9, 1, P) per-tap validity masks

        # --- conv1 (1x1, padding handled on the input) + folded BN + ReLU ---
        feat = jnp.maximum(
            jnp.dot(w1_ref[...], x, preferred_element_type=f32) + b1_ref[...], 0.0)   # (F, P)

        def conv3x3(inp, w, b):
            # im2col: the 9 masked lane-rolled taps are stacked along the (16-row aligned)
            # sublane axis and contracted in a single (F, 9F) @ (9F, P) MXU matmul.
            cols = []
            for t in range(9):
                tap = pltpu.roll(inp, rolls[t], axis=1) if rolls[t] else inp
                cols.append(tap * masks[t])
            patches = jnp.concatenate(cols, axis=0)                        # (9F, P)
            return jnp.dot(w, patches, preferred_element_type=f32) + b     # (F, P)

        # --- residual tower ---
        for blk in range(BLOCKS):
            h = jnp.maximum(conv3x3(feat, wres_ref[2 * blk], bres_ref[2 * blk]), 0.0)
            h = conv3x3(h, wres_ref[2 * blk + 1], bres_ref[2 * blk + 1]) + feat
            feat = jnp.maximum(h, 0.0)

        # --- policy (2 ch) + value (1 ch) 1x1 convs fused into one matmul, BN folded ---
        head = jnp.maximum(
            jnp.dot(whead_ref[...], feat, preferred_element_type=f32) + bhead_ref[...], 0.0)  # (3, P)

        # policy FC over the NCHW-flattened (2*P) features; wfc pre-split per channel
        logits = (jnp.dot(head[0:1, :], wfc0_ref[...], preferred_element_type=f32)
                  + jnp.dot(head[1:2, :], wfc1_ref[...], preferred_element_type=f32)
                  + bfc_ref[...])                                            # (1, A)
        z = logits - jnp.max(logits, axis=-1, keepdims=True)
        pi_ref[0] = z - jnp.log(jnp.sum(jnp.exp(z), axis=-1, keepdims=True))  # log_softmax(dim=1)

        # value head: FC 64 + FC 1, (tanh + 1) / 2
        hidden = jnp.maximum(
            jnp.dot(head[2:3, :], wv1_ref[...], preferred_element_type=f32) + bv1_ref[...], 0.0)
        v = jnp.dot(hidden, wv2_ref[...], preferred_element_type=f32) + bv2_ref[...]
        v_ref[0] = (jnp.tanh(v) + 1.0) * 0.5

    return kernel


# ----------------------------------------------------------------------------
# Wrapper: input padding, weight re-layout, pallas_call with a batch grid
# ----------------------------------------------------------------------------
def gamenet_forward(x_nchw, params):
    (w1, b1, wres, bres, wp, bp, wfc, bfc, wv, bv, wv1, bv1, wv2, bv2) = params
    B, cin, n, _ = x_nchw.shape
    F = FILTERS
    Hp = n + 2
    P = Hp * Hp
    A = n * n
    P_pad = ((P + 127) // 128) * 128      # lane-dense spatial width

    # ---- input: zero-pad spatially (conv1 has padding=1), flatten HW onto the lane axis ----
    xp = jnp.pad(x_nchw.astype(jnp.float32), ((0, 0), (0, 0), (1, 1), (1, 1)))
    x_in = jnp.pad(xp.reshape(B, cin, P), ((0, 0), (0, 0), (0, P_pad - P)))      # (B, Cin, P_pad)

    # ---- per-tap lane-roll amounts and validity masks for the 3x3 convs ----
    rolls, mask_rows = [], []
    q = jnp.arange(P_pad)
    yy, xx = q // Hp, q % Hp
    inside = q < P
    for dy in (-1, 0, 1):
        for dx in (-1, 0, 1):
            rolls.append((-(dy * Hp + dx)) % P_pad)     # dest p reads source p + dy*Hp + dx
            valid = inside & (yy + dy >= 0) & (yy + dy < Hp) & (xx + dx >= 0) & (xx + dx < Hp)
            mask_rows.append(valid.astype(jnp.float32))
    masks = jnp.stack(mask_rows)[:, None, :]            # (9, 1, P_pad)

    # ---- pre-layout weights (XLA side, negligible) ----
    w1_k = jnp.transpose(w1)                                                  # (F, Cin)
    b1_k = b1.reshape(F, 1)
    wres_k = jnp.transpose(wres.reshape(2 * BLOCKS, 9 * F, F), (0, 2, 1))     # (6, F, 9F)
    bres_k = bres.reshape(2 * BLOCKS, F, 1)
    whead = jnp.concatenate([wp, wv], axis=0)                                 # (3, F)
    bhead = jnp.concatenate([bp, bv]).reshape(3, 1)
    pad_rows = ((0, P_pad - P), (0, 0))
    wfc0 = jnp.pad(wfc[:P], pad_rows)                                         # (P_pad, A)
    wfc1 = jnp.pad(wfc[P:], pad_rows)
    wv1_k = jnp.pad(wv1, pad_rows)                                            # (P_pad, 64)
    bfc_k = bfc.reshape(1, A)
    bv1_k = bv1.reshape(1, 64)
    bv2_k = bv2.reshape(1, 1)

    kernel = _make_kernel(tuple(rolls))

    def batch_spec(shape):
        nd = len(shape) - 1
        return pl.BlockSpec((1,) + shape[1:], lambda i, _nd=nd: (i,) + (0,) * _nd)

    def full_spec(shape):
        nd = len(shape)
        return pl.BlockSpec(shape, lambda i, _nd=nd: (0,) * _nd)

    weights = (masks, w1_k, b1_k, wres_k, bres_k, whead, bhead,
               wfc0, wfc1, bfc_k, wv1_k, bv1_k, wv2, bv2_k)

    pi3, v3 = pl.pallas_call(
        kernel,
        out_shape=(jax.ShapeDtypeStruct((B, 1, A), jnp.float32),
                   jax.ShapeDtypeStruct((B, 1, 1), jnp.float32)),
        grid=(B,),
        in_specs=[batch_spec(x_in.shape)] + [full_spec(w.shape) for w in weights],
        out_specs=(batch_spec((B, 1, A)), batch_spec((B, 1, 1))),
        compiler_params=pltpu.CompilerParams(dimension_semantics=("parallel",)),
    )(x_in, *weights)
    return pi3[:, 0, :], v3[:, 0, :]


# ----------------------------------------------------------------------------
# Deterministic parameter construction (BN folded into conv weights, eval mode)
# ----------------------------------------------------------------------------
def make_params(key, n, cin):
    Hp, P, A, F = n + 2, (n + 2) ** 2, n * n, FILTERS
    eps = 1e-5
    keys = iter(jax.random.split(key, 64))

    def nxt():
        return next(keys)

    def w_init(shape, scale=0.1):
        return scale * jax.random.normal(nxt(), shape, jnp.float32)

    def b_init(shape):
        return 0.05 * jax.random.normal(nxt(), shape, jnp.float32)

    def bn_init(c):
        gamma = 1.0 + 0.1 * jax.random.normal(nxt(), (c,), jnp.float32)
        beta = 0.05 * jax.random.normal(nxt(), (c,), jnp.float32)
        mean = 0.05 * jax.random.normal(nxt(), (c,), jnp.float32)
        var = 0.5 + jax.random.uniform(nxt(), (c,), jnp.float32)
        return gamma, beta, mean, var

    def fold_last(w, b, bn):  # BN folded along the output-channel (last) axis
        gamma, beta, mean, var = bn
        s = gamma / jnp.sqrt(var + eps)
        return w * s, (b - mean) * s + beta

    # conv1 (1x1): weight (Cin, F)
    w1, b1 = fold_last(w_init((cin, F)), b_init((F,)), bn_init(F))

    # residual blocks: 3 blocks x 2 convs, each (3,3,Cin=F,Cout=F) in HWIO
    wres_l, bres_l = [], []
    for _ in range(2 * BLOCKS):
        w_f, b_f = fold_last(w_init((3, 3, F, F)), b_init((F,)), bn_init(F))
        wres_l.append(w_f)
        bres_l.append(b_f)
    wres = jnp.stack(wres_l)       # (6, 3, 3, F, F)
    bres = jnp.stack(bres_l)       # (6, F)

    # policy head
    wp_raw, bp_raw = w_init((2, F)), b_init((2,))
    gamma, beta, mean, var = bn_init(2)
    s = gamma / jnp.sqrt(var + eps)
    wp = wp_raw * s[:, None]
    bp = (bp_raw - mean) * s + beta
    wfc = w_init((2 * P, A))
    bfc = b_init((A,))

    # value head
    wv_raw, bv_raw = w_init((1, F)), b_init((1,))
    gamma, beta, mean, var = bn_init(1)
    s = gamma / jnp.sqrt(var + eps)
    wv = wv_raw * s[:, None]
    bv = (bv_raw - mean) * s + beta
    wv1 = w_init((P, 64))
    bv1 = b_init((64,))
    wv2 = w_init((64, 1))
    bv2 = b_init((1,))

    return (w1, b1, wres, bres, wp, bp, wfc, bfc, wv, bv, wv1, bv1, wv2, bv2)


# ----------------------------------------------------------------------------
# Pure-JAX reference (same folded parameters) for correctness checking
# ----------------------------------------------------------------------------
def ref_forward(x_nchw, params):
    (w1, b1, wres, bres, wp, bp, wfc, bfc, wv, bv, wv1, bv1, wv2, bv2) = params
    B, _, n, _ = x_nchw.shape
    P = (n + 2) ** 2
    hi = jax.lax.Precision.HIGHEST
    dn = ('NHWC', 'HWIO', 'NHWC')
    x = jnp.transpose(x_nchw, (0, 2, 3, 1)).astype(jnp.float32)

    def conv(inp, w_hwio, pad):
        return jax.lax.conv_general_dilated(
            inp, w_hwio, (1, 1), ((pad, pad), (pad, pad)),
            dimension_numbers=dn, precision=hi)

    feat = jax.nn.relu(conv(x, w1[None, None], 1) + b1)
    for blk in range(BLOCKS):
        res = feat
        h = jax.nn.relu(conv(feat, wres[2 * blk], 1) + bres[2 * blk])
        h = conv(h, wres[2 * blk + 1], 1) + bres[2 * blk + 1] + res
        feat = jax.nn.relu(h)

    pol = jax.nn.relu(conv(feat, jnp.transpose(wp)[None, None], 0) + bp)
    pol_flat = jnp.transpose(pol, (0, 3, 1, 2)).reshape(B, 2 * P)   # NCHW .view()
    logits = jnp.dot(pol_flat, wfc, precision=hi) + bfc
    pi = jax.nn.log_softmax(logits, axis=1)

    val = jax.nn.relu(conv(feat, jnp.transpose(wv)[None, None], 0) + bv)
    h = jax.nn.relu(jnp.dot(val.reshape(B, P), wv1, precision=hi) + bv1)
    v = jnp.dot(h, wv2, precision=hi) + bv2
    return pi, (jnp.tanh(v) + 1.0) * 0.5


if __name__ == "__main__":
    n = 8                          # board_x == board_y == n
    board_feature_channel = 3
    cin = board_feature_channel + 1
    B = 2

    key = jax.random.PRNGKey(0)
    kx, kp = jax.random.split(key)
    x = jax.random.normal(kx, (B, cin, n, n), jnp.float32)   # NCHW, like PyTorch
    params = make_params(kp, n, cin)

    pi, v = jax.jit(gamenet_forward)(x, params)
    jax.block_until_ready((pi, v))

    # sanity + correctness vs pure-JAX reference
    assert pi.shape == (B, n * n) and v.shape == (B, 1)
    assert bool(jnp.all(jnp.isfinite(pi))) and bool(jnp.all(jnp.isfinite(v)))
    assert bool(jnp.allclose(jnp.sum(jnp.exp(pi), axis=1), 1.0, atol=1e-3))
    assert bool(jnp.all((v >= 0.0) & (v <= 1.0)))

    pi_ref, v_ref = ref_forward(x, params)
    if not (bool(jnp.allclose(pi, pi_ref, atol=2e-2, rtol=2e-2)) and
            bool(jnp.allclose(v, v_ref, atol=2e-2, rtol=2e-2))):
        raise AssertionError("Pallas kernel output does not match JAX reference")

    print("KERNEL_OK")
</pallas_src>

<mosaic_0001>
module attributes {stable_mosaic.version = 11 : i64} {
  func.func @kernel(%arg0: i32, %arg1: memref<1x4x128xf32, #tpu.memory_space<vmem>>, %arg2: memref<9x1x128xf32, #tpu.memory_space<vmem>>, %arg3: memref<16x4xf32, #tpu.memory_space<vmem>>, %arg4: memref<16x1xf32, #tpu.memory_space<vmem>>, %arg5: memref<6x16x144xf32, #tpu.memory_space<vmem>>, %arg6: memref<6x16x1xf32, #tpu.memory_space<vmem>>, %arg7: memref<3x16xf32, #tpu.memory_space<vmem>>, %arg8: memref<3x1xf32, #tpu.memory_space<vmem>>, %arg9: memref<128x64xf32, #tpu.memory_space<vmem>>, %arg10: memref<128x64xf32, #tpu.memory_space<vmem>>, %arg11: memref<1x64xf32, #tpu.memory_space<vmem>>, %arg12: memref<128x64xf32, #tpu.memory_space<vmem>>, %arg13: memref<1x64xf32, #tpu.memory_space<vmem>>, %arg14: memref<64x1xf32, #tpu.memory_space<vmem>>, %arg15: memref<1x1xf32, #tpu.memory_space<vmem>>, %arg16: memref<1x1x64xf32, #tpu.memory_space<vmem>>, %arg17: memref<1x1x1xf32, #tpu.memory_space<vmem>>) attributes {dimension_semantics = [#tpu.dimension_semantics<parallel>], iteration_bounds = array<i64: 2>, scalar_prefetch = 0 : i64, scratch_operands = 0 : i64, tpu.core_type = #tpu.core_type<tc>, window_params = [{transform_indices = @transform_0, window_bounds = array<i64: 1, 4, 128>}, {pipeline_mode = #tpu.pipeline_mode<synchronous>, transform_indices = @transform_1, window_bounds = array<i64: 9, 1, 128>}, {pipeline_mode = #tpu.pipeline_mode<synchronous>, transform_indices = @transform_2, window_bounds = array<i64: 16, 4>}, {pipeline_mode = #tpu.pipeline_mode<synchronous>, transform_indices = @transform_3, window_bounds = array<i64: 16, 1>}, {pipeline_mode = #tpu.pipeline_mode<synchronous>, transform_indices = @transform_4, window_bounds = array<i64: 6, 16, 144>}, {pipeline_mode = #tpu.pipeline_mode<synchronous>, transform_indices = @transform_5, window_bounds = array<i64: 6, 16, 1>}, {pipeline_mode = #tpu.pipeline_mode<synchronous>, transform_indices = @transform_6, window_bounds = array<i64: 3, 16>}, {pipeline_mode = #tpu.pipeline_mode<synchronous>, transform_indices = @transform_7, window_bounds = array<i64: 3, 1>}, {pipeline_mode = #tpu.pipeline_mode<synchronous>, transform_indices = @transform_8, window_bounds = array<i64: 128, 64>}, {pipeline_mode = #tpu.pipeline_mode<synchronous>, transform_indices = @transform_9, window_bounds = array<i64: 128, 64>}, {pipeline_mode = #tpu.pipeline_mode<synchronous>, transform_indices = @transform_10, window_bounds = array<i64: 1, 64>}, {pipeline_mode = #tpu.pipeline_mode<synchronous>, transform_indices = @transform_11, window_bounds = array<i64: 128, 64>}, {pipeline_mode = #tpu.pipeline_mode<synchronous>, transform_indices = @transform_12, window_bounds = array<i64: 1, 64>}, {pipeline_mode = #tpu.pipeline_mode<synchronous>, transform_indices = @transform_13, window_bounds = array<i64: 64, 1>}, {pipeline_mode = #tpu.pipeline_mode<synchronous>, transform_indices = @transform_14, window_bounds = array<i64: 1, 1>}, {transform_indices = @transform_15, window_bounds = array<i64: 1, 1, 64>}, {transform_indices = @transform_16, window_bounds = array<i64: 1, 1, 1>}]} {
    %c0 = arith.constant 0 : index
    %c0_0 = arith.constant 0 : index
    %c0_1 = arith.constant 0 : index
    %0 = vector.load %arg1[%c0, %c0_0, %c0_1] : memref<1x4x128xf32, #tpu.memory_space<vmem>>, vector<1x4x128xf32>
    %1 = vector.shape_cast %0 : vector<1x4x128xf32> to vector<4x128xf32>
    %c0_2 = arith.constant 0 : index
    %c0_3 = arith.constant 0 : index
    %c0_4 = arith.constant 0 : index
    %2 = vector.load %arg2[%c0_2, %c0_3, %c0_4] : memref<9x1x128xf32, #tpu.memory_space<vmem>>, vector<9x1x128xf32>
    %c0_5 = arith.constant 0 : index
    %c0_6 = arith.constant 0 : index
    %3 = vector.load %arg3[%c0_5, %c0_6] : memref<16x4xf32, #tpu.memory_space<vmem>>, vector<16x4xf32>
    %cst = arith.constant dense<0.000000e+00> : vector<16x128xf32>
    %4 = tpu.matmul %3, %1, %cst {dimension_numbers = #tpu.dot_dimension_numbers<[1], [0], [0], [1], [0, 0, 1, 1], [], []>} : vector<16x4xf32>, vector<4x128xf32>, vector<16x128xf32> -> vector<16x128xf32>
    %c0_7 = arith.constant 0 : index
    %c0_8 = arith.constant 0 : index
    %5 = vector.load %arg4[%c0_7, %c0_8] : memref<16x1xf32, #tpu.memory_space<vmem>>, vector<16x1xf32>
    %6 = vector.broadcast %5 : vector<16x1xf32> to vector<16x128xf32>
    %7 = arith.addf %4, %6 : vector<16x128xf32>
    %cst_9 = arith.constant 0.000000e+00 : f32
    %8 = vector.broadcast %cst_9 : f32 to vector<16x128xf32>
    %9 = arith.maximumf %7, %8 : vector<16x128xf32>
    %c0_10 = arith.constant 0 : index
    %c0_11 = arith.constant 0 : index
    %c0_12 = arith.constant 0 : index
    %10 = vector.load %arg5[%c0_10, %c0_11, %c0_12] : memref<6x16x144xf32, #tpu.memory_space<vmem>>, vector<1x16x144xf32>
    %11 = vector.shape_cast %10 : vector<1x16x144xf32> to vector<16x144xf32>
    %c0_13 = arith.constant 0 : index
    %c0_14 = arith.constant 0 : index
    %c0_15 = arith.constant 0 : index
    %12 = vector.load %arg6[%c0_13, %c0_14, %c0_15] : memref<6x16x1xf32, #tpu.memory_space<vmem>>, vector<1x16x1xf32>
    %13 = vector.shape_cast %12 : vector<1x16x1xf32> to vector<16x1xf32>
    %c11_i32 = arith.constant 11 : i32
    %14 = tpu.dynamic_rotate %9 by %c11_i32 dim 1 : vector<16x128xf32>, i32 -> vector<16x128xf32>
    %15 = vector.extract_strided_slice %2 {offsets = [0, 0, 0], sizes = [1, 1, 128], strides = [1, 1, 1]} : vector<9x1x128xf32> to vector<1x1x128xf32>
    %16 = vector.shape_cast %15 : vector<1x1x128xf32> to vector<1x128xf32>
    %17 = vector.broadcast %16 : vector<1x128xf32> to vector<16x128xf32>
    %18 = arith.mulf %14, %17 : vector<16x128xf32>
    %c10_i32 = arith.constant 10 : i32
    %19 = tpu.dynamic_rotate %9 by %c10_i32 dim 1 : vector<16x128xf32>, i32 -> vector<16x128xf32>
    %20 = vector.extract_strided_slice %2 {offsets = [1, 0, 0], sizes = [1, 1, 128], strides = [1, 1, 1]} : vector<9x1x128xf32> to vector<1x1x128xf32>
    %21 = vector.shape_cast %20 : vector<1x1x128xf32> to vector<1x128xf32>
    %22 = vector.broadcast %21 : vector<1x128xf32> to vector<16x128xf32>
    %23 = arith.mulf %19, %22 : vector<16x128xf32>
    %c9_i32 = arith.constant 9 : i32
    %24 = tpu.dynamic_rotate %9 by %c9_i32 dim 1 : vector<16x128xf32>, i32 -> vector<16x128xf32>
    %25 = vector.extract_strided_slice %2 {offsets = [2, 0, 0], sizes = [1, 1, 128], strides = [1, 1, 1]} : vector<9x1x128xf32> to vector<1x1x128xf32>
    %26 = vector.shape_cast %25 : vector<1x1x128xf32> to vector<1x128xf32>
    %27 = vector.broadcast %26 : vector<1x128xf32> to vector<16x128xf32>
    %28 = arith.mulf %24, %27 : vector<16x128xf32>
    %c1_i32 = arith.constant 1 : i32
    %29 = tpu.dynamic_rotate %9 by %c1_i32 dim 1 : vector<16x128xf32>, i32 -> vector<16x128xf32>
    %30 = vector.extract_strided_slice %2 {offsets = [3, 0, 0], sizes = [1, 1, 128], strides = [1, 1, 1]} : vector<9x1x128xf32> to vector<1x1x128xf32>
    %31 = vector.shape_cast %30 : vector<1x1x128xf32> to vector<1x128xf32>
    %32 = vector.broadcast %31 : vector<1x128xf32> to vector<16x128xf32>
    %33 = arith.mulf %29, %32 : vector<16x128xf32>
    %34 = vector.extract_strided_slice %2 {offsets = [4, 0, 0], sizes = [1, 1, 128], strides = [1, 1, 1]} : vector<9x1x128xf32> to vector<1x1x128xf32>
    %35 = vector.shape_cast %34 : vector<1x1x128xf32> to vector<1x128xf32>
    %36 = vector.broadcast %35 : vector<1x128xf32> to vector<16x128xf32>
    %37 = arith.mulf %9, %36 : vector<16x128xf32>
    %c127_i32 = arith.constant 127 : i32
    %38 = tpu.dynamic_rotate %9 by %c127_i32 dim 1 : vector<16x128xf32>, i32 -> vector<16x128xf32>
    %39 = vector.extract_strided_slice %2 {offsets = [5, 0, 0], sizes = [1, 1, 128], strides = [1, 1, 1]} : vector<9x1x128xf32> to vector<1x1x128xf32>
    %40 = vector.shape_cast %39 : vector<1x1x128xf32> to vector<1x128xf32>
    %41 = vector.broadcast %40 : vector<1x128xf32> to vector<16x128xf32>
    %42 = arith.mulf %38, %41 : vector<16x128xf32>
    %c119_i32 = arith.constant 119 : i32
    %43 = tpu.dynamic_rotate %9 by %c119_i32 dim 1 : vector<16x128xf32>, i32 -> vector<16x128xf32>
    %44 = vector.extract_strided_slice %2 {offsets = [6, 0, 0], sizes = [1, 1, 128], strides = [1, 1, 1]} : vector<9x1x128xf32> to vector<1x1x128xf32>
    %45 = vector.shape_cast %44 : vector<1x1x128xf32> to vector<1x128xf32>
    %46 = vector.broadcast %45 : vector<1x128xf32> to vector<16x128xf32>
    %47 = arith.mulf %43, %46 : vector<16x128xf32>
    %c118_i32 = arith.constant 118 : i32
    %48 = tpu.dynamic_rotate %9 by %c118_i32 dim 1 : vector<16x128xf32>, i32 -> vector<16x128xf32>
    %49 = vector.extract_strided_slice %2 {offsets = [7, 0, 0], sizes = [1, 1, 128], strides = [1, 1, 1]} : vector<9x1x128xf32> to vector<1x1x128xf32>
    %50 = vector.shape_cast %49 : vector<1x1x128xf32> to vector<1x128xf32>
    %51 = vector.broadcast %50 : vector<1x128xf32> to vector<16x128xf32>
    %52 = arith.mulf %48, %51 : vector<16x128xf32>
    %c117_i32 = arith.constant 117 : i32
    %53 = tpu.dynamic_rotate %9 by %c117_i32 dim 1 : vector<16x128xf32>, i32 -> vector<16x128xf32>
    %54 = vector.extract_strided_slice %2 {offsets = [8, 0, 0], sizes = [1, 1, 128], strides = [1, 1, 1]} : vector<9x1x128xf32> to vector<1x1x128xf32>
    %55 = vector.shape_cast %54 : vector<1x1x128xf32> to vector<1x128xf32>
    %56 = vector.broadcast %55 : vector<1x128xf32> to vector<16x128xf32>
    %57 = arith.mulf %53, %56 : vector<16x128xf32>
    %58 = tpu.concatenate %18, %23, %28, %33, %37, %42, %47, %52, %57 in 0 : vector<16x128xf32>, vector<16x128xf32>, vector<16x128xf32>, vector<16x128xf32>, vector<16x128xf32>, vector<16x128xf32>, vector<16x128xf32>, vector<16x128xf32>, vector<16x128xf32> -> vector<144x128xf32>
    %cst_16 = arith.constant dense<0.000000e+00> : vector<16x128xf32>
    %59 = tpu.matmul %11, %58, %cst_16 {dimension_numbers = #tpu.dot_dimension_numbers<[1], [0], [0], [1], [0, 0, 1, 1], [], []>} : vector<16x144xf32>, vector<144x128xf32>, vector<16x128xf32> -> vector<16x128xf32>
    %60 = vector.broadcast %13 : vector<16x1xf32> to vector<16x128xf32>
    %61 = arith.addf %59, %60 : vector<16x128xf32>
    %cst_17 = arith.constant 0.000000e+00 : f32
    %62 = vector.broadcast %cst_17 : f32 to vector<16x128xf32>
    %63 = arith.maximumf %61, %62 : vector<16x128xf32>
    %c1 = arith.constant 1 : index
    %c0_18 = arith.constant 0 : index
    %c0_19 = arith.constant 0 : index
    %64 = vector.load %arg5[%c1, %c0_18, %c0_19] : memref<6x16x144xf32, #tpu.memory_space<vmem>>, vector<1x16x144xf32>
    %65 = vector.shape_cast %64 : vector<1x16x144xf32> to vector<16x144xf32>
    %c1_20 = arith.constant 1 : index
    %c0_21 = arith.constant 0 : index
    %c0_22 = arith.constant 0 : index
    %66 = vector.load %arg6[%c1_20, %c0_21, %c0_22] : memref<6x16x1xf32, #tpu.memory_space<vmem>>, vector<1x16x1xf32>
    %67 = vector.shape_cast %66 : vector<1x16x1xf32> to vector<16x1xf32>
    %c11_i32_23 = arith.constant 11 : i32
    %68 = tpu.dynamic_rotate %63 by %c11_i32_23 dim 1 : vector<16x128xf32>, i32 -> vector<16x128xf32>
    %69 = vector.extract_strided_slice %2 {offsets = [0, 0, 0], sizes = [1, 1, 128], strides = [1, 1, 1]} : vector<9x1x128xf32> to vector<1x1x128xf32>
    %70 = vector.shape_cast %69 : vector<1x1x128xf32> to vector<1x128xf32>
    %71 = vector.broadcast %70 : vector<1x128xf32> to vector<16x128xf32>
    %72 = arith.mulf %68, %71 : vector<16x128xf32>
    %c10_i32_24 = arith.constant 10 : i32
    %73 = tpu.dynamic_rotate %63 by %c10_i32_24 dim 1 : vector<16x128xf32>, i32 -> vector<16x128xf32>
    %74 = vector.extract_strided_slice %2 {offsets = [1, 0, 0], sizes = [1, 1, 128], strides = [1, 1, 1]} : vector<9x1x128xf32> to vector<1x1x128xf32>
    %75 = vector.shape_cast %74 : vector<1x1x128xf32> to vector<1x128xf32>
    %76 = vector.broadcast %75 : vector<1x128xf32> to vector<16x128xf32>
    %77 = arith.mulf %73, %76 : vector<16x128xf32>
    %c9_i32_25 = arith.constant 9 : i32
    %78 = tpu.dynamic_rotate %63 by %c9_i32_25 dim 1 : vector<16x128xf32>, i32 -> vector<16x128xf32>
    %79 = vector.extract_strided_slice %2 {offsets = [2, 0, 0], sizes = [1, 1, 128], strides = [1, 1, 1]} : vector<9x1x128xf32> to vector<1x1x128xf32>
    %80 = vector.shape_cast %79 : vector<1x1x128xf32> to vector<1x128xf32>
    %81 = vector.broadcast %80 : vector<1x128xf32> to vector<16x128xf32>
    %82 = arith.mulf %78, %81 : vector<16x128xf32>
    %c1_i32_26 = arith.constant 1 : i32
    %83 = tpu.dynamic_rotate %63 by %c1_i32_26 dim 1 : vector<16x128xf32>, i32 -> vector<16x128xf32>
    %84 = vector.extract_strided_slice %2 {offsets = [3, 0, 0], sizes = [1, 1, 128], strides = [1, 1, 1]} : vector<9x1x128xf32> to vector<1x1x128xf32>
    %85 = vector.shape_cast %84 : vector<1x1x128xf32> to vector<1x128xf32>
    %86 = vector.broadcast %85 : vector<1x128xf32> to vector<16x128xf32>
    %87 = arith.mulf %83, %86 : vector<16x128xf32>
    %88 = vector.extract_strided_slice %2 {offsets = [4, 0, 0], sizes = [1, 1, 128], strides = [1, 1, 1]} : vector<9x1x128xf32> to vector<1x1x128xf32>
    %89 = vector.shape_cast %88 : vector<1x1x128xf32> to vector<1x128xf32>
    %90 = vector.broadcast %89 : vector<1x128xf32> to vector<16x128xf32>
    %91 = arith.mulf %63, %90 : vector<16x128xf32>
    %c127_i32_27 = arith.constant 127 : i32
    %92 = tpu.dynamic_rotate %63 by %c127_i32_27 dim 1 : vector<16x128xf32>, i32 -> vector<16x128xf32>
    %93 = vector.extract_strided_slice %2 {offsets = [5, 0, 0], sizes = [1, 1, 128], strides = [1, 1, 1]} : vector<9x1x128xf32> to vector<1x1x128xf32>
    %94 = vector.shape_cast %93 : vector<1x1x128xf32> to vector<1x128xf32>
    %95 = vector.broadcast %94 : vector<1x128xf32> to vector<16x128xf32>
    %96 = arith.mulf %92, %95 : vector<16x128xf32>
    %c119_i32_28 = arith.constant 119 : i32
    %97 = tpu.dynamic_rotate %63 by %c119_i32_28 dim 1 : vector<16x128xf32>, i32 -> vector<16x128xf32>
    %98 = vector.extract_strided_slice %2 {offsets = [6, 0, 0], sizes = [1, 1, 128], strides = [1, 1, 1]} : vector<9x1x128xf32> to vector<1x1x128xf32>
    %99 = vector.shape_cast %98 : vector<1x1x128xf32> to vector<1x128xf32>
    %100 = vector.broadcast %99 : vector<1x128xf32> to vector<16x128xf32>
    %101 = arith.mulf %97, %100 : vector<16x128xf32>
    %c118_i32_29 = arith.constant 118 : i32
    %102 = tpu.dynamic_rotate %63 by %c118_i32_29 dim 1 : vector<16x128xf32>, i32 -> vector<16x128xf32>
    %103 = vector.extract_strided_slice %2 {offsets = [7, 0, 0], sizes = [1, 1, 128], strides = [1, 1, 1]} : vector<9x1x128xf32> to vector<1x1x128xf32>
    %104 = vector.shape_cast %103 : vector<1x1x128xf32> to vector<1x128xf32>
    %105 = vector.broadcast %104 : vector<1x128xf32> to vector<16x128xf32>
    %106 = arith.mulf %102, %105 : vector<16x128xf32>
    %c117_i32_30 = arith.constant 117 : i32
    %107 = tpu.dynamic_rotate %63 by %c117_i32_30 dim 1 : vector<16x128xf32>, i32 -> vector<16x128xf32>
    %108 = vector.extract_strided_slice %2 {offsets = [8, 0, 0], sizes = [1, 1, 128], strides = [1, 1, 1]} : vector<9x1x128xf32> to vector<1x1x128xf32>
    %109 = vector.shape_cast %108 : vector<1x1x128xf32> to vector<1x128xf32>
    %110 = vector.broadcast %109 : vector<1x128xf32> to vector<16x128xf32>
    %111 = arith.mulf %107, %110 : vector<16x128xf32>
    %112 = tpu.concatenate %72, %77, %82, %87, %91, %96, %101, %106, %111 in 0 : vector<16x128xf32>, vector<16x128xf32>, vector<16x128xf32>, vector<16x128xf32>, vector<16x128xf32>, vector<16x128xf32>, vector<16x128xf32>, vector<16x128xf32>, vector<16x128xf32> -> vector<144x128xf32>
    %cst_31 = arith.constant dense<0.000000e+00> : vector<16x128xf32>
    %113 = tpu.matmul %65, %112, %cst_31 {dimension_numbers = #tpu.dot_dimension_numbers<[1], [0], [0], [1], [0, 0, 1, 1], [], []>} : vector<16x144xf32>, vector<144x128xf32>, vector<16x128xf32> -> vector<16x128xf32>
    %114 = vector.broadcast %67 : vector<16x1xf32> to vector<16x128xf32>
    %115 = arith.addf %113, %114 : vector<16x128xf32>
    %116 = arith.addf %115, %9 : vector<16x128xf32>
    %cst_32 = arith.constant 0.000000e+00 : f32
    %117 = vector.broadcast %cst_32 : f32 to vector<16x128xf32>
    %118 = arith.maximumf %116, %117 : vector<16x128xf32>
    %c2 = arith.constant 2 : index
    %c0_33 = arith.constant 0 : index
    %c0_34 = arith.constant 0 : index
    %119 = vector.load %arg5[%c2, %c0_33, %c0_34] : memref<6x16x144xf32, #tpu.memory_space<vmem>>, vector<1x16x144xf32>
    %120 = vector.shape_cast %119 : vector<1x16x144xf32> to vector<16x144xf32>
    %c2_35 = arith.constant 2 : index
    %c0_36 = arith.constant 0 : index
    %c0_37 = arith.constant 0 : index
    %121 = vector.load %arg6[%c2_35, %c0_36, %c0_37] : memref<6x16x1xf32, #tpu.memory_space<vmem>>, vector<1x16x1xf32>
    %122 = vector.shape_cast %121 : vector<1x16x1xf32> to vector<16x1xf32>
    %c11_i32_38 = arith.constant 11 : i32
    %123 = tpu.dynamic_rotate %118 by %c11_i32_38 dim 1 : vector<16x128xf32>, i32 -> vector<16x128xf32>
    %124 = vector.extract_strided_slice %2 {offsets = [0, 0, 0], sizes = [1, 1, 128], strides = [1, 1, 1]} : vector<9x1x128xf32> to vector<1x1x128xf32>
    %125 = vector.shape_cast %124 : vector<1x1x128xf32> to vector<1x128xf32>
    %126 = vector.broadcast %125 : vector<1x128xf32> to vector<16x128xf32>
    %127 = arith.mulf %123, %126 : vector<16x128xf32>
    %c10_i32_39 = arith.constant 10 : i32
    %128 = tpu.dynamic_rotate %118 by %c10_i32_39 dim 1 : vector<16x128xf32>, i32 -> vector<16x128xf32>
    %129 = vector.extract_strided_slice %2 {offsets = [1, 0, 0], sizes = [1, 1, 128], strides = [1, 1, 1]} : vector<9x1x128xf32> to vector<1x1x128xf32>
    %130 = vector.shape_cast %129 : vector<1x1x128xf32> to vector<1x128xf32>
    %131 = vector.broadcast %130 : vector<1x128xf32> to vector<16x128xf32>
    %132 = arith.mulf %128, %131 : vector<16x128xf32>
    %c9_i32_40 = arith.constant 9 : i32
    %133 = tpu.dynamic_rotate %118 by %c9_i32_40 dim 1 : vector<16x128xf32>, i32 -> vector<16x128xf32>
    %134 = vector.extract_strided_slice %2 {offsets = [2, 0, 0], sizes = [1, 1, 128], strides = [1, 1, 1]} : vector<9x1x128xf32> to vector<1x1x128xf32>
    %135 = vector.shape_cast %134 : vector<1x1x128xf32> to vector<1x128xf32>
    %136 = vector.broadcast %135 : vector<1x128xf32> to vector<16x128xf32>
    %137 = arith.mulf %133, %136 : vector<16x128xf32>
    %c1_i32_41 = arith.constant 1 : i32
    %138 = tpu.dynamic_rotate %118 by %c1_i32_41 dim 1 : vector<16x128xf32>, i32 -> vector<16x128xf32>
    %139 = vector.extract_strided_slice %2 {offsets = [3, 0, 0], sizes = [1, 1, 128], strides = [1, 1, 1]} : vector<9x1x128xf32> to vector<1x1x128xf32>
    %140 = vector.shape_cast %139 : vector<1x1x128xf32> to vector<1x128xf32>
    %141 = vector.broadcast %140 : vector<1x128xf32> to vector<16x128xf32>
    %142 = arith.mulf %138, %141 : vector<16x128xf32>
    %143 = vector.extract_strided_slice %2 {offsets = [4, 0, 0], sizes = [1, 1, 128], strides = [1, 1, 1]} : vector<9x1x128xf32> to vector<1x1x128xf32>
    %144 = vector.shape_cast %143 : vector<1x1x128xf32> to vector<1x128xf32>
    %145 = vector.broadcast %144 : vector<1x128xf32> to vector<16x128xf32>
    %146 = arith.mulf %118, %145 : vector<16x128xf32>
    %c127_i32_42 = arith.constant 127 : i32
    %147 = tpu.dynamic_rotate %118 by %c127_i32_42 dim 1 : vector<16x128xf32>, i32 -> vector<16x128xf32>
    %148 = vector.extract_strided_slice %2 {offsets = [5, 0, 0], sizes = [1, 1, 128], strides = [1, 1, 1]} : vector<9x1x128xf32> to vector<1x1x128xf32>
    %149 = vector.shape_cast %148 : vector<1x1x128xf32> to vector<1x128xf32>
    %150 = vector.broadcast %149 : vector<1x128xf32> to vector<16x128xf32>
    %151 = arith.mulf %147, %150 : vector<16x128xf32>
    %c119_i32_43 = arith.constant 119 : i32
    %152 = tpu.dynamic_rotate %118 by %c119_i32_43 dim 1 : vector<16x128xf32>, i32 -> vector<16x128xf32>
    %153 = vector.extract_strided_slice %2 {offsets = [6, 0, 0], sizes = [1, 1, 128], strides = [1, 1, 1]} : vector<9x1x128xf32> to vector<1x1x128xf32>
    %154 = vector.shape_cast %153 : vector<1x1x128xf32> to vector<1x128xf32>
    %155 = vector.broadcast %154 : vector<1x128xf32> to vector<16x128xf32>
    %156 = arith.mulf %152, %155 : vector<16x128xf32>
    %c118_i32_44 = arith.constant 118 : i32
    %157 = tpu.dynamic_rotate %118 by %c118_i32_44 dim 1 : vector<16x128xf32>, i32 -> vector<16x128xf32>
    %158 = vector.extract_strided_slice %2 {offsets = [7, 0, 0], sizes = [1, 1, 128], strides = [1, 1, 1]} : vector<9x1x128xf32> to vector<1x1x128xf32>
    %159 = vector.shape_cast %158 : vector<1x1x128xf32> to vector<1x128xf32>
    %160 = vector.broadcast %159 : vector<1x128xf32> to vector<16x128xf32>
    %161 = arith.mulf %157, %160 : vector<16x128xf32>
    %c117_i32_45 = arith.constant 117 : i32
    %162 = tpu.dynamic_rotate %118 by %c117_i32_45 dim 1 : vector<16x128xf32>, i32 -> vector<16x128xf32>
    %163 = vector.extract_strided_slice %2 {offsets = [8, 0, 0], sizes = [1, 1, 128], strides = [1, 1, 1]} : vector<9x1x128xf32> to vector<1x1x128xf32>
    %164 = vector.shape_cast %163 : vector<1x1x128xf32> to vector<1x128xf32>
    %165 = vector.broadcast %164 : vector<1x128xf32> to vector<16x128xf32>
    %166 = arith.mulf %162, %165 : vector<16x128xf32>
    %167 = tpu.concatenate %127, %132, %137, %142, %146, %151, %156, %161, %166 in 0 : vector<16x128xf32>, vector<16x128xf32>, vector<16x128xf32>, vector<16x128xf32>, vector<16x128xf32>, vector<16x128xf32>, vector<16x128xf32>, vector<16x128xf32>, vector<16x128xf32> -> vector<144x128xf32>
    %cst_46 = arith.constant dense<0.000000e+00> : vector<16x128xf32>
    %168 = tpu.matmul %120, %167, %cst_46 {dimension_numbers = #tpu.dot_dimension_numbers<[1], [0], [0], [1], [0, 0, 1, 1], [], []>} : vector<16x144xf32>, vector<144x128xf32>, vector<16x128xf32> -> vector<16x128xf32>
    %169 = vector.broadcast %122 : vector<16x1xf32> to vector<16x128xf32>
    %170 = arith.addf %168, %169 : vector<16x128xf32>
    %cst_47 = arith.constant 0.000000e+00 : f32
    %171 = vector.broadcast %cst_47 : f32 to vector<16x128xf32>
    %172 = arith.maximumf %170, %171 : vector<16x128xf32>
    %c3 = arith.constant 3 : index
    %c0_48 = arith.constant 0 : index
    %c0_49 = arith.constant 0 : index
    %173 = vector.load %arg5[%c3, %c0_48, %c0_49] : memref<6x16x144xf32, #tpu.memory_space<vmem>>, vector<1x16x144xf32>
    %174 = vector.shape_cast %173 : vector<1x16x144xf32> to vector<16x144xf32>
    %c3_50 = arith.constant 3 : index
    %c0_51 = arith.constant 0 : index
    %c0_52 = arith.constant 0 : index
    %175 = vector.load %arg6[%c3_50, %c0_51, %c0_52] : memref<6x16x1xf32, #tpu.memory_space<vmem>>, vector<1x16x1xf32>
    %176 = vector.shape_cast %175 : vector<1x16x1xf32> to vector<16x1xf32>
    %c11_i32_53 = arith.constant 11 : i32
    %177 = tpu.dynamic_rotate %172 by %c11_i32_53 dim 1 : vector<16x128xf32>, i32 -> vector<16x128xf32>
    %178 = vector.extract_strided_slice %2 {offsets = [0, 0, 0], sizes = [1, 1, 128], strides = [1, 1, 1]} : vector<9x1x128xf32> to vector<1x1x128xf32>
    %179 = vector.shape_cast %178 : vector<1x1x128xf32> to vector<1x128xf32>
    %180 = vector.broadcast %179 : vector<1x128xf32> to vector<16x128xf32>
    %181 = arith.mulf %177, %180 : vector<16x128xf32>
    %c10_i32_54 = arith.constant 10 : i32
    %182 = tpu.dynamic_rotate %172 by %c10_i32_54 dim 1 : vector<16x128xf32>, i32 -> vector<16x128xf32>
    %183 = vector.extract_strided_slice %2 {offsets = [1, 0, 0], sizes = [1, 1, 128], strides = [1, 1, 1]} : vector<9x1x128xf32> to vector<1x1x128xf32>
    %184 = vector.shape_cast %183 : vector<1x1x128xf32> to vector<1x128xf32>
    %185 = vector.broadcast %184 : vector<1x128xf32> to vector<16x128xf32>
    %186 = arith.mulf %182, %185 : vector<16x128xf32>
    %c9_i32_55 = arith.constant 9 : i32
    %187 = tpu.dynamic_rotate %172 by %c9_i32_55 dim 1 : vector<16x128xf32>, i32 -> vector<16x128xf32>
    %188 = vector.extract_strided_slice %2 {offsets = [2, 0, 0], sizes = [1, 1, 128], strides = [1, 1, 1]} : vector<9x1x128xf32> to vector<1x1x128xf32>
    %189 = vector.shape_cast %188 : vector<1x1x128xf32> to vector<1x128xf32>
    %190 = vector.broadcast %189 : vector<1x128xf32> to vector<16x128xf32>
    %191 = arith.mulf %187, %190 : vector<16x128xf32>
    %c1_i32_56 = arith.constant 1 : i32
    %192 = tpu.dynamic_rotate %172 by %c1_i32_56 dim 1 : vector<16x128xf32>, i32 -> vector<16x128xf32>
    %193 = vector.extract_strided_slice %2 {offsets = [3, 0, 0], sizes = [1, 1, 128], strides = [1, 1, 1]} : vector<9x1x128xf32> to vector<1x1x128xf32>
    %194 = vector.shape_cast %193 : vector<1x1x128xf32> to vector<1x128xf32>
    %195 = vector.broadcast %194 : vector<1x128xf32> to vector<16x128xf32>
    %196 = arith.mulf %192, %195 : vector<16x128xf32>
    %197 = vector.extract_strided_slice %2 {offsets = [4, 0, 0], sizes = [1, 1, 128], strides = [1, 1, 1]} : vector<9x1x128xf32> to vector<1x1x128xf32>
    %198 = vector.shape_cast %197 : vector<1x1x128xf32> to vector<1x128xf32>
    %199 = vector.broadcast %198 : vector<1x128xf32> to vector<16x128xf32>
    %200 = arith.mulf %172, %199 : vector<16x128xf32>
    %c127_i32_57 = arith.constant 127 : i32
    %201 = tpu.dynamic_rotate %172 by %c127_i32_57 dim 1 : vector<16x128xf32>, i32 -> vector<16x128xf32>
    %202 = vector.extract_strided_slice %2 {offsets = [5, 0, 0], sizes = [1, 1, 128], strides = [1, 1, 1]} : vector<9x1x128xf32> to vector<1x1x128xf32>
    %203 = vector.shape_cast %202 : vector<1x1x128xf32> to vector<1x128xf32>
    %204 = vector.broadcast %203 : vector<1x128xf32> to vector<16x128xf32>
    %205 = arith.mulf %201, %204 : vector<16x128xf32>
    %c119_i32_58 = arith.constant 119 : i32
    %206 = tpu.dynamic_rotate %172 by %c119_i32_58 dim 1 : vector<16x128xf32>, i32 -> vector<16x128xf32>
    %207 = vector.extract_strided_slice %2 {offsets = [6, 0, 0], sizes = [1, 1, 128], strides = [1, 1, 1]} : vector<9x1x128xf32> to vector<1x1x128xf32>
    %208 = vector.shape_cast %207 : vector<1x1x128xf32> to vector<1x128xf32>
    %209 = vector.broadcast %208 : vector<1x128xf32> to vector<16x128xf32>
    %210 = arith.mulf %206, %209 : vector<16x128xf32>
    %c118_i32_59 = arith.constant 118 : i32
    %211 = tpu.dynamic_rotate %172 by %c118_i32_59 dim 1 : vector<16x128xf32>, i32 -> vector<16x128xf32>
    %212 = vector.extract_strided_slice %2 {offsets = [7, 0, 0], sizes = [1, 1, 128], strides = [1, 1, 1]} : vector<9x1x128xf32> to vector<1x1x128xf32>
    %213 = vector.shape_cast %212 : vector<1x1x128xf32> to vector<1x128xf32>
    %214 = vector.broadcast %213 : vector<1x128xf32> to vector<16x128xf32>
    %215 = arith.mulf %211, %214 : vector<16x128xf32>
    %c117_i32_60 = arith.constant 117 : i32
    %216 = tpu.dynamic_rotate %172 by %c117_i32_60 dim 1 : vector<16x128xf32>, i32 -> vector<16x128xf32>
    %217 = vector.extract_strided_slice %2 {offsets = [8, 0, 0], sizes = [1, 1, 128], strides = [1, 1, 1]} : vector<9x1x128xf32> to vector<1x1x128xf32>
    %218 = vector.shape_cast %217 : vector<1x1x128xf32> to vector<1x128xf32>
    %219 = vector.broadcast %218 : vector<1x128xf32> to vector<16x128xf32>
    %220 = arith.mulf %216, %219 : vector<16x128xf32>
    %221 = tpu.concatenate %181, %186, %191, %196, %200, %205, %210, %215, %220 in 0 : vector<16x128xf32>, vector<16x128xf32>, vector<16x128xf32>, vector<16x128xf32>, vector<16x128xf32>, vector<16x128xf32>, vector<16x128xf32>, vector<16x128xf32>, vector<16x128xf32> -> vector<144x128xf32>
    %cst_61 = arith.constant dense<0.000000e+00> : vector<16x128xf32>
    %222 = tpu.matmul %174, %221, %cst_61 {dimension_numbers = #tpu.dot_dimension_numbers<[1], [0], [0], [1], [0, 0, 1, 1], [], []>} : vector<16x144xf32>, vector<144x128xf32>, vector<16x128xf32> -> vector<16x128xf32>
    %223 = vector.broadcast %176 : vector<16x1xf32> to vector<16x128xf32>
    %224 = arith.addf %222, %223 : vector<16x128xf32>
    %225 = arith.addf %224, %118 : vector<16x128xf32>
    %cst_62 = arith.constant 0.000000e+00 : f32
    %226 = vector.broadcast %cst_62 : f32 to vector<16x128xf32>
    %227 = arith.maximumf %225, %226 : vector<16x128xf32>
    %c4 = arith.constant 4 : index
    %c0_63 = arith.constant 0 : index
    %c0_64 = arith.constant 0 : index
    %228 = vector.load %arg5[%c4, %c0_63, %c0_64] : memref<6x16x144xf32, #tpu.memory_space<vmem>>, vector<1x16x144xf32>
    %229 = vector.shape_cast %228 : vector<1x16x144xf32> to vector<16x144xf32>
    %c4_65 = arith.constant 4 : index
    %c0_66 = arith.constant 0 : index
    %c0_67 = arith.constant 0 : index
    %230 = vector.load %arg6[%c4_65, %c0_66, %c0_67] : memref<6x16x1xf32, #tpu.memory_space<vmem>>, vector<1x16x1xf32>
    %231 = vector.shape_cast %230 : vector<1x16x1xf32> to vector<16x1xf32>
    %c11_i32_68 = arith.constant 11 : i32
    %232 = tpu.dynamic_rotate %227 by %c11_i32_68 dim 1 : vector<16x128xf32>, i32 -> vector<16x128xf32>
    %233 = vector.extract_strided_slice %2 {offsets = [0, 0, 0], sizes = [1, 1, 128], strides = [1, 1, 1]} : vector<9x1x128xf32> to vector<1x1x128xf32>
    %234 = vector.shape_cast %233 : vector<1x1x128xf32> to vector<1x128xf32>
    %235 = vector.broadcast %234 : vector<1x128xf32> to vector<16x128xf32>
    %236 = arith.mulf %232, %235 : vector<16x128xf32>
    %c10_i32_69 = arith.constant 10 : i32
    %237 = tpu.dynamic_rotate %227 by %c10_i32_69 dim 1 : vector<16x128xf32>, i32 -> vector<16x128xf32>
    %238 = vector.extract_strided_slice %2 {offsets = [1, 0, 0], sizes = [1, 1, 128], strides = [1, 1, 1]} : vector<9x1x128xf32> to vector<1x1x128xf32>
    %239 = vector.shape_cast %238 : vector<1x1x128xf32> to vector<1x128xf32>
    %240 = vector.broadcast %239 : vector<1x128xf32> to vector<16x128xf32>
    %241 = arith.mulf %237, %240 : vector<16x128xf32>
    %c9_i32_70 = arith.constant 9 : i32
    %242 = tpu.dynamic_rotate %227 by %c9_i32_70 dim 1 : vector<16x128xf32>, i32 -> vector<16x128xf32>
    %243 = vector.extract_strided_slice %2 {offsets = [2, 0, 0], sizes = [1, 1, 128], strides = [1, 1, 1]} : vector<9x1x128xf32> to vector<1x1x128xf32>
    %244 = vector.shape_cast %243 : vector<1x1x128xf32> to vector<1x128xf32>
    %245 = vector.broadcast %244 : vector<1x128xf32> to vector<16x128xf32>
    %246 = arith.mulf %242, %245 : vector<16x128xf32>
    %c1_i32_71 = arith.constant 1 : i32
    %247 = tpu.dynamic_rotate %227 by %c1_i32_71 dim 1 : vector<16x128xf32>, i32 -> vector<16x128xf32>
    %248 = vector.extract_strided_slice %2 {offsets = [3, 0, 0], sizes = [1, 1, 128], strides = [1, 1, 1]} : vector<9x1x128xf32> to vector<1x1x128xf32>
    %249 = vector.shape_cast %248 : vector<1x1x128xf32> to vector<1x128xf32>
    %250 = vector.broadcast %249 : vector<1x128xf32> to vector<16x128xf32>
    %251 = arith.mulf %247, %250 : vector<16x128xf32>
    %252 = vector.extract_strided_slice %2 {offsets = [4, 0, 0], sizes = [1, 1, 128], strides = [1, 1, 1]} : vector<9x1x128xf32> to vector<1x1x128xf32>
    %253 = vector.shape_cast %252 : vector<1x1x128xf32> to vector<1x128xf32>
    %254 = vector.broadcast %253 : vector<1x128xf32> to vector<16x128xf32>
    %255 = arith.mulf %227, %254 : vector<16x128xf32>
    %c127_i32_72 = arith.constant 127 : i32
    %256 = tpu.dynamic_rotate %227 by %c127_i32_72 dim 1 : vector<16x128xf32>, i32 -> vector<16x128xf32>
    %257 = vector.extract_strided_slice %2 {offsets = [5, 0, 0], sizes = [1, 1, 128], strides = [1, 1, 1]} : vector<9x1x128xf32> to vector<1x1x128xf32>
    %258 = vector.shape_cast %257 : vector<1x1x128xf32> to vector<1x128xf32>
    %259 = vector.broadcast %258 : vector<1x128xf32> to vector<16x128xf32>
    %260 = arith.mulf %256, %259 : vector<16x128xf32>
    %c119_i32_73 = arith.constant 119 : i32
    %261 = tpu.dynamic_rotate %227 by %c119_i32_73 dim 1 : vector<16x128xf32>, i32 -> vector<16x128xf32>
    %262 = vector.extract_strided_slice %2 {offsets = [6, 0, 0], sizes = [1, 1, 128], strides = [1, 1, 1]} : vector<9x1x128xf32> to vector<1x1x128xf32>
    %263 = vector.shape_cast %262 : vector<1x1x128xf32> to vector<1x128xf32>
    %264 = vector.broadcast %263 : vector<1x128xf32> to vector<16x128xf32>
    %265 = arith.mulf %261, %264 : vector<16x128xf32>
    %c118_i32_74 = arith.constant 118 : i32
    %266 = tpu.dynamic_rotate %227 by %c118_i32_74 dim 1 : vector<16x128xf32>, i32 -> vector<16x128xf32>
    %267 = vector.extract_strided_slice %2 {offsets = [7, 0, 0], sizes = [1, 1, 128], strides = [1, 1, 1]} : vector<9x1x128xf32> to vector<1x1x128xf32>
    %268 = vector.shape_cast %267 : vector<1x1x128xf32> to vector<1x128xf32>
    %269 = vector.broadcast %268 : vector<1x128xf32> to vector<16x128xf32>
    %270 = arith.mulf %266, %269 : vector<16x128xf32>
    %c117_i32_75 = arith.constant 117 : i32
    %271 = tpu.dynamic_rotate %227 by %c117_i32_75 dim 1 : vector<16x128xf32>, i32 -> vector<16x128xf32>
    %272 = vector.extract_strided_slice %2 {offsets = [8, 0, 0], sizes = [1, 1, 128], strides = [1, 1, 1]} : vector<9x1x128xf32> to vector<1x1x128xf32>
    %273 = vector.shape_cast %272 : vector<1x1x128xf32> to vector<1x128xf32>
    %274 = vector.broadcast %273 : vector<1x128xf32> to vector<16x128xf32>
    %275 = arith.mulf %271, %274 : vector<16x128xf32>
    %276 = tpu.concatenate %236, %241, %246, %251, %255, %260, %265, %270, %275 in 0 : vector<16x128xf32>, vector<16x128xf32>, vector<16x128xf32>, vector<16x128xf32>, vector<16x128xf32>, vector<16x128xf32>, vector<16x128xf32>, vector<16x128xf32>, vector<16x128xf32> -> vector<144x128xf32>
    %cst_76 = arith.constant dense<0.000000e+00> : vector<16x128xf32>
    %277 = tpu.matmul %229, %276, %cst_76 {dimension_numbers = #tpu.dot_dimension_numbers<[1], [0], [0], [1], [0, 0, 1, 1], [], []>} : vector<16x144xf32>, vector<144x128xf32>, vector<16x128xf32> -> vector<16x128xf32>
    %278 = vector.broadcast %231 : vector<16x1xf32> to vector<16x128xf32>
    %279 = arith.addf %277, %278 : vector<16x128xf32>
    %cst_77 = arith.constant 0.000000e+00 : f32
    %280 = vector.broadcast %cst_77 : f32 to vector<16x128xf32>
    %281 = arith.maximumf %279, %280 : vector<16x128xf32>
    %c5 = arith.constant 5 : index
    %c0_78 = arith.constant 0 : index
    %c0_79 = arith.constant 0 : index
    %282 = vector.load %arg5[%c5, %c0_78, %c0_79] : memref<6x16x144xf32, #tpu.memory_space<vmem>>, vector<1x16x144xf32>
    %283 = vector.shape_cast %282 : vector<1x16x144xf32> to vector<16x144xf32>
    %c5_80 = arith.constant 5 : index
    %c0_81 = arith.constant 0 : index
    %c0_82 = arith.constant 0 : index
    %284 = vector.load %arg6[%c5_80, %c0_81, %c0_82] : memref<6x16x1xf32, #tpu.memory_space<vmem>>, vector<1x16x1xf32>
    %285 = vector.shape_cast %284 : vector<1x16x1xf32> to vector<16x1xf32>
    %c11_i32_83 = arith.constant 11 : i32
    %286 = tpu.dynamic_rotate %281 by %c11_i32_83 dim 1 : vector<16x128xf32>, i32 -> vector<16x128xf32>
    %287 = vector.extract_strided_slice %2 {offsets = [0, 0, 0], sizes = [1, 1, 128], strides = [1, 1, 1]} : vector<9x1x128xf32> to vector<1x1x128xf32>
    %288 = vector.shape_cast %287 : vector<1x1x128xf32> to vector<1x128xf32>
    %289 = vector.broadcast %288 : vector<1x128xf32> to vector<16x128xf32>
    %290 = arith.mulf %286, %289 : vector<16x128xf32>
    %c10_i32_84 = arith.constant 10 : i32
    %291 = tpu.dynamic_rotate %281 by %c10_i32_84 dim 1 : vector<16x128xf32>, i32 -> vector<16x128xf32>
    %292 = vector.extract_strided_slice %2 {offsets = [1, 0, 0], sizes = [1, 1, 128], strides = [1, 1, 1]} : vector<9x1x128xf32> to vector<1x1x128xf32>
    %293 = vector.shape_cast %292 : vector<1x1x128xf32> to vector<1x128xf32>
    %294 = vector.broadcast %293 : vector<1x128xf32> to vector<16x128xf32>
    %295 = arith.mulf %291, %294 : vector<16x128xf32>
    %c9_i32_85 = arith.constant 9 : i32
    %296 = tpu.dynamic_rotate %281 by %c9_i32_85 dim 1 : vector<16x128xf32>, i32 -> vector<16x128xf32>
    %297 = vector.extract_strided_slice %2 {offsets = [2, 0, 0], sizes = [1, 1, 128], strides = [1, 1, 1]} : vector<9x1x128xf32> to vector<1x1x128xf32>
    %298 = vector.shape_cast %297 : vector<1x1x128xf32> to vector<1x128xf32>
    %299 = vector.broadcast %298 : vector<1x128xf32> to vector<16x128xf32>
    %300 = arith.mulf %296, %299 : vector<16x128xf32>
    %c1_i32_86 = arith.constant 1 : i32
    %301 = tpu.dynamic_rotate %281 by %c1_i32_86 dim 1 : vector<16x128xf32>, i32 -> vector<16x128xf32>
    %302 = vector.extract_strided_slice %2 {offsets = [3, 0, 0], sizes = [1, 1, 128], strides = [1, 1, 1]} : vector<9x1x128xf32> to vector<1x1x128xf32>
    %303 = vector.shape_cast %302 : vector<1x1x128xf32> to vector<1x128xf32>
    %304 = vector.broadcast %303 : vector<1x128xf32> to vector<16x128xf32>
    %305 = arith.mulf %301, %304 : vector<16x128xf32>
    %306 = vector.extract_strided_slice %2 {offsets = [4, 0, 0], sizes = [1, 1, 128], strides = [1, 1, 1]} : vector<9x1x128xf32> to vector<1x1x128xf32>
    %307 = vector.shape_cast %306 : vector<1x1x128xf32> to vector<1x128xf32>
    %308 = vector.broadcast %307 : vector<1x128xf32> to vector<16x128xf32>
    %309 = arith.mulf %281, %308 : vector<16x128xf32>
    %c127_i32_87 = arith.constant 127 : i32
    %310 = tpu.dynamic_rotate %281 by %c127_i32_87 dim 1 : vector<16x128xf32>, i32 -> vector<16x128xf32>
    %311 = vector.extract_strided_slice %2 {offsets = [5, 0, 0], sizes = [1, 1, 128], strides = [1, 1, 1]} : vector<9x1x128xf32> to vector<1x1x128xf32>
    %312 = vector.shape_cast %311 : vector<1x1x128xf32> to vector<1x128xf32>
    %313 = vector.broadcast %312 : vector<1x128xf32> to vector<16x128xf32>
    %314 = arith.mulf %310, %313 : vector<16x128xf32>
    %c119_i32_88 = arith.constant 119 : i32
    %315 = tpu.dynamic_rotate %281 by %c119_i32_88 dim 1 : vector<16x128xf32>, i32 -> vector<16x128xf32>
    %316 = vector.extract_strided_slice %2 {offsets = [6, 0, 0], sizes = [1, 1, 128], strides = [1, 1, 1]} : vector<9x1x128xf32> to vector<1x1x128xf32>
    %317 = vector.shape_cast %316 : vector<1x1x128xf32> to vector<1x128xf32>
    %318 = vector.broadcast %317 : vector<1x128xf32> to vector<16x128xf32>
    %319 = arith.mulf %315, %318 : vector<16x128xf32>
    %c118_i32_89 = arith.constant 118 : i32
    %320 = tpu.dynamic_rotate %281 by %c118_i32_89 dim 1 : vector<16x128xf32>, i32 -> vector<16x128xf32>
    %321 = vector.extract_strided_slice %2 {offsets = [7, 0, 0], sizes = [1, 1, 128], strides = [1, 1, 1]} : vector<9x1x128xf32> to vector<1x1x128xf32>
    %322 = vector.shape_cast %321 : vector<1x1x128xf32> to vector<1x128xf32>
    %323 = vector.broadcast %322 : vector<1x128xf32> to vector<16x128xf32>
    %324 = arith.mulf %320, %323 : vector<16x128xf32>
    %c117_i32_90 = arith.constant 117 : i32
    %325 = tpu.dynamic_rotate %281 by %c117_i32_90 dim 1 : vector<16x128xf32>, i32 -> vector<16x128xf32>
    %326 = vector.extract_strided_slice %2 {offsets = [8, 0, 0], sizes = [1, 1, 128], strides = [1, 1, 1]} : vector<9x1x128xf32> to vector<1x1x128xf32>
    %327 = vector.shape_cast %326 : vector<1x1x128xf32> to vector<1x128xf32>
    %328 = vector.broadcast %327 : vector<1x128xf32> to vector<16x128xf32>
    %329 = arith.mulf %325, %328 : vector<16x128xf32>
    %330 = tpu.concatenate %290, %295, %300, %305, %309, %314, %319, %324, %329 in 0 : vector<16x128xf32>, vector<16x128xf32>, vector<16x128xf32>, vector<16x128xf32>, vector<16x128xf32>, vector<16x128xf32>, vector<16x128xf32>, vector<16x128xf32>, vector<16x128xf32> -> vector<144x128xf32>
    %cst_91 = arith.constant dense<0.000000e+00> : vector<16x128xf32>
    %331 = tpu.matmul %283, %330, %cst_91 {dimension_numbers = #tpu.dot_dimension_numbers<[1], [0], [0], [1], [0, 0, 1, 1], [], []>} : vector<16x144xf32>, vector<144x128xf32>, vector<16x128xf32> -> vector<16x128xf32>
    %332 = vector.broadcast %285 : vector<16x1xf32> to vector<16x128xf32>
    %333 = arith.addf %331, %332 : vector<16x128xf32>
    %334 = arith.addf %333, %227 : vector<16x128xf32>
    %cst_92 = arith.constant 0.000000e+00 : f32
    %335 = vector.broadcast %cst_92 : f32 to vector<16x128xf32>
    %336 = arith.maximumf %334, %335 : vector<16x128xf32>
    %c0_93 = arith.constant 0 : index
    %c0_94 = arith.constant 0 : index
    %337 = vector.load %arg7[%c0_93, %c0_94] : memref<3x16xf32, #tpu.memory_space<vmem>>, vector<3x16xf32>
    %cst_95 = arith.constant dense<0.000000e+00> : vector<3x128xf32>
    %338 = tpu.matmul %337, %336, %cst_95 {dimension_numbers = #tpu.dot_dimension_numbers<[1], [0], [0], [1], [0, 0, 1, 1], [], []>} : vector<3x16xf32>, vector<16x128xf32>, vector<3x128xf32> -> vector<3x128xf32>
    %c0_96 = arith.constant 0 : index
    %c0_97 = arith.constant 0 : index
    %339 = vector.load %arg8[%c0_96, %c0_97] : memref<3x1xf32, #tpu.memory_space<vmem>>, vector<3x1xf32>
    %340 = vector.broadcast %339 : vector<3x1xf32> to vector<3x128xf32>
    %341 = arith.addf %338, %340 : vector<3x128xf32>
    %cst_98 = arith.constant 0.000000e+00 : f32
    %342 = vector.broadcast %cst_98 : f32 to vector<3x128xf32>
    %343 = arith.maximumf %341, %342 : vector<3x128xf32>
    %344 = vector.extract_strided_slice %343 {offsets = [0, 0], sizes = [1, 128], strides = [1, 1]} : vector<3x128xf32> to vector<1x128xf32>
    %c0_99 = arith.constant 0 : index
    %c0_100 = arith.constant 0 : index
    %345 = vector.load %arg9[%c0_99, %c0_100] : memref<128x64xf32, #tpu.memory_space<vmem>>, vector<128x64xf32>
    %cst_101 = arith.constant dense<0.000000e+00> : vector<1x64xf32>
    %346 = tpu.matmul %344, %345, %cst_101 {dimension_numbers = #tpu.dot_dimension_numbers<[1], [0], [0], [1], [0, 0, 1, 1], [], []>} : vector<1x128xf32>, vector<128x64xf32>, vector<1x64xf32> -> vector<1x64xf32>
    %347 = vector.extract_strided_slice %343 {offsets = [1, 0], sizes = [1, 128], strides = [1, 1]} : vector<3x128xf32> to vector<1x128xf32>
    %c0_102 = arith.constant 0 : index
    %c0_103 = arith.constant 0 : index
    %348 = vector.load %arg10[%c0_102, %c0_103] : memref<128x64xf32, #tpu.memory_space<vmem>>, vector<128x64xf32>
    %cst_104 = arith.constant dense<0.000000e+00> : vector<1x64xf32>
    %349 = tpu.matmul %347, %348, %cst_104 {dimension_numbers = #tpu.dot_dimension_numbers<[1], [0], [0], [1], [0, 0, 1, 1], [], []>} : vector<1x128xf32>, vector<128x64xf32>, vector<1x64xf32> -> vector<1x64xf32>
    %350 = arith.addf %346, %349 : vector<1x64xf32>
    %c0_105 = arith.constant 0 : index
    %c0_106 = arith.constant 0 : index
    %351 = vector.load %arg11[%c0_105, %c0_106] : memref<1x64xf32, #tpu.memory_space<vmem>>, vector<1x64xf32>
    %352 = arith.addf %350, %351 : vector<1x64xf32>
    %cst_107 = arith.constant dense<0xFF800000> : vector<1xf32>
    %353 = vector.multi_reduction <maximumf>, %352, %cst_107 [1] : vector<1x64xf32> to vector<1xf32>
    %354 = vector.shape_cast %353 : vector<1xf32> to vector<1x1xf32>
    %355 = vector.broadcast %354 : vector<1x1xf32> to vector<1x64xf32>
    %356 = arith.subf %352, %355 : vector<1x64xf32>
    %357 = math.exp %356 : vector<1x64xf32>
    %cst_108 = arith.constant dense<0.000000e+00> : vector<1xf32>
    %358 = vector.multi_reduction <add>, %357, %cst_108 [1] : vector<1x64xf32> to vector<1xf32>
    %359 = vector.shape_cast %358 : vector<1xf32> to vector<1x1xf32>
    %360 = math.log %359 : vector<1x1xf32>
    %361 = vector.broadcast %360 : vector<1x1xf32> to vector<1x64xf32>
    %362 = arith.subf %356, %361 : vector<1x64xf32>
    %c0_109 = arith.constant 0 : index
    %c0_110 = arith.constant 0 : index
    %c0_111 = arith.constant 0 : index
    %363 = vector.load %arg16[%c0_109, %c0_110, %c0_111] : memref<1x1x64xf32, #tpu.memory_space<vmem>>, vector<1x1x64xf32>
    %364 = vector.shape_cast %363 : vector<1x1x64xf32> to vector<1x64xf32>
    %365 = vector.shape_cast %362 : vector<1x64xf32> to vector<1x1x64xf32>
    tpu.vector_store %arg16[%c0_109, %c0_110, %c0_111], %365 {strides = array<i32>} : memref<1x1x64xf32, #tpu.memory_space<vmem>>, vector<1x1x64xf32>,
    %366 = vector.extract_strided_slice %343 {offsets = [2, 0], sizes = [1, 128], strides = [1, 1]} : vector<3x128xf32> to vector<1x128xf32>
    %c0_112 = arith.constant 0 : index
    %c0_113 = arith.constant 0 : index
    %367 = vector.load %arg12[%c0_112, %c0_113] : memref<128x64xf32, #tpu.memory_space<vmem>>, vector<128x64xf32>
    %cst_114 = arith.constant dense<0.000000e+00> : vector<1x64xf32>
    %368 = tpu.matmul %366, %367, %cst_114 {dimension_numbers = #tpu.dot_dimension_numbers<[1], [0], [0], [1], [0, 0, 1, 1], [], []>} : vector<1x128xf32>, vector<128x64xf32>, vector<1x64xf32> -> vector<1x64xf32>
    %c0_115 = arith.constant 0 : index
    %c0_116 = arith.constant 0 : index
    %369 = vector.load %arg13[%c0_115, %c0_116] : memref<1x64xf32, #tpu.memory_space<vmem>>, vector<1x64xf32>
    %370 = arith.addf %368, %369 : vector<1x64xf32>
    %cst_117 = arith.constant 0.000000e+00 : f32
    %371 = vector.broadcast %cst_117 : f32 to vector<1x64xf32>
    %372 = arith.maximumf %370, %371 : vector<1x64xf32>
    %c0_118 = arith.constant 0 : index
    %c0_119 = arith.constant 0 : index
    %373 = vector.load %arg14[%c0_118, %c0_119] : memref<64x1xf32, #tpu.memory_space<vmem>>, vector<64x1xf32>
    %cst_120 = arith.constant dense<0.000000e+00> : vector<1x1xf32>
    %374 = tpu.matmul %372, %373, %cst_120 {dimension_numbers = #tpu.dot_dimension_numbers<[1], [0], [0], [1], [0, 0, 1, 1], [], []>} : vector<1x64xf32>, vector<64x1xf32>, vector<1x1xf32> -> vector<1x1xf32>
    %c0_121 = arith.constant 0 : index
    %c0_122 = arith.constant 0 : index
    %375 = vector.load %arg15[%c0_121, %c0_122] : memref<1x1xf32, #tpu.memory_space<vmem>>, vector<1x1xf32>
    %376 = arith.addf %374, %375 : vector<1x1xf32>
    %377 = math.tanh %376 : vector<1x1xf32>
    %cst_123 = arith.constant 1.000000e+00 : f32
    %378 = vector.broadcast %cst_123 : f32 to vector<1x1xf32>
    %379 = arith.addf %377, %378 : vector<1x1xf32>
    %cst_124 = arith.constant 5.000000e-01 : f32
    %380 = vector.broadcast %cst_124 : f32 to vector<1x1xf32>
    %381 = arith.mulf %379, %380 : vector<1x1xf32>
    %c0_125 = arith.constant 0 : index
    %c0_126 = arith.constant 0 : index
    %c0_127 = arith.constant 0 : index
    %382 = vector.load %arg17[%c0_125, %c0_126, %c0_127] : memref<1x1x1xf32, #tpu.memory_space<vmem>>, vector<1x1x1xf32>
    %383 = vector.shape_cast %382 : vector<1x1x1xf32> to vector<1x1xf32>
    %384 = vector.shape_cast %381 : vector<1x1xf32> to vector<1x1x1xf32>
    tpu.vector_store %arg17[%c0_125, %c0_126, %c0_127], %384 {strides = array<i32>} : memref<1x1x1xf32, #tpu.memory_space<vmem>>, vector<1x1x1xf32>,
    return
  }
  func.func @transform_0(%arg0: i32) -> (i32, i32, i32) {
    %c0_i32 = arith.constant 0 : i32
    %c0_i32_0 = arith.constant 0 : i32
    %c0_i32_1 = arith.constant 0 : i32
    return %arg0, %c0_i32, %c0_i32_0 : i32, i32, i32
  }
  func.func @transform_1(%arg0: i32) -> (i32, i32, i32) {
    %c0_i32 = arith.constant 0 : i32
    %c0_i32_0 = arith.constant 0 : i32
    %c0_i32_1 = arith.constant 0 : i32
    %c0_i32_2 = arith.constant 0 : i32
    return %c0_i32, %c0_i32_0, %c0_i32_1 : i32, i32, i32
  }
  func.func @transform_2(%arg0: i32) -> (i32, i32) {
    %c0_i32 = arith.constant 0 : i32
    %c0_i32_0 = arith.constant 0 : i32
    %c0_i32_1 = arith.constant 0 : i32
    return %c0_i32, %c0_i32_0 : i32, i32
  }
  func.func @transform_3(%arg0: i32) -> (i32, i32) {
    %c0_i32 = arith.constant 0 : i32
    %c0_i32_0 = arith.constant 0 : i32
    %c0_i32_1 = arith.constant 0 : i32
    return %c0_i32, %c0_i32_0 : i32, i32
  }
  func.func @transform_4(%arg0: i32) -> (i32, i32, i32) {
    %c0_i32 = arith.constant 0 : i32
    %c0_i32_0 = arith.constant 0 : i32
    %c0_i32_1 = arith.constant 0 : i32
    %c0_i32_2 = arith.constant 0 : i32
    return %c0_i32, %c0_i32_0, %c0_i32_1 : i32, i32, i32
  }
  func.func @transform_5(%arg0: i32) -> (i32, i32, i32) {
    %c0_i32 = arith.constant 0 : i32
    %c0_i32_0 = arith.constant 0 : i32
    %c0_i32_1 = arith.constant 0 : i32
    %c0_i32_2 = arith.constant 0 : i32
    return %c0_i32, %c0_i32_0, %c0_i32_1 : i32, i32, i32
  }
  func.func @transform_6(%arg0: i32) -> (i32, i32) {
    %c0_i32 = arith.constant 0 : i32
    %c0_i32_0 = arith.constant 0 : i32
    %c0_i32_1 = arith.constant 0 : i32
    return %c0_i32, %c0_i32_0 : i32, i32
  }
  func.func @transform_7(%arg0: i32) -> (i32, i32) {
    %c0_i32 = arith.constant 0 : i32
    %c0_i32_0 = arith.constant 0 : i32
    %c0_i32_1 = arith.constant 0 : i32
    return %c0_i32, %c0_i32_0 : i32, i32
  }
  func.func @transform_8(%arg0: i32) -> (i32, i32) {
    %c0_i32 = arith.constant 0 : i32
    %c0_i32_0 = arith.constant 0 : i32
    %c0_i32_1 = arith.constant 0 : i32
    return %c0_i32, %c0_i32_0 : i32, i32
  }
  func.func @transform_9(%arg0: i32) -> (i32, i32) {
    %c0_i32 = arith.constant 0 : i32
    %c0_i32_0 = arith.constant 0 : i32
    %c0_i32_1 = arith.constant 0 : i32
    return %c0_i32, %c0_i32_0 : i32, i32
  }
  func.func @transform_10(%arg0: i32) -> (i32, i32) {
    %c0_i32 = arith.constant 0 : i32
    %c0_i32_0 = arith.constant 0 : i32
    %c0_i32_1 = arith.constant 0 : i32
    return %c0_i32, %c0_i32_0 : i32, i32
  }
  func.func @transform_11(%arg0: i32) -> (i32, i32) {
    %c0_i32 = arith.constant 0 : i32
    %c0_i32_0 = arith.constant 0 : i32
    %c0_i32_1 = arith.constant 0 : i32
    return %c0_i32, %c0_i32_0 : i32, i32
  }
  func.func @transform_12(%arg0: i32) -> (i32, i32) {
    %c0_i32 = arith.constant 0 : i32
    %c0_i32_0 = arith.constant 0 : i32
    %c0_i32_1 = arith.constant 0 : i32
    return %c0_i32, %c0_i32_0 : i32, i32
  }
  func.func @transform_13(%arg0: i32) -> (i32, i32) {
    %c0_i32 = arith.constant 0 : i32
    %c0_i32_0 = arith.constant 0 : i32
    %c0_i32_1 = arith.constant 0 : i32
    return %c0_i32, %c0_i32_0 : i32, i32
  }
  func.func @transform_14(%arg0: i32) -> (i32, i32) {
    %c0_i32 = arith.constant 0 : i32
    %c0_i32_0 = arith.constant 0 : i32
    %c0_i32_1 = arith.constant 0 : i32
    return %c0_i32, %c0_i32_0 : i32, i32
  }
  func.func @transform_15(%arg0: i32) -> (i32, i32, i32) {
    %c0_i32 = arith.constant 0 : i32
    %c0_i32_0 = arith.constant 0 : i32
    %c0_i32_1 = arith.constant 0 : i32
    return %arg0, %c0_i32, %c0_i32_0 : i32, i32, i32
  }
  func.func @transform_16(%arg0: i32) -> (i32, i32, i32) {
    %c0_i32 = arith.constant 0 : i32
    %c0_i32_0 = arith.constant 0 : i32
    %c0_i32_1 = arith.constant 0 : i32
    return %arg0, %c0_i32, %c0_i32_0 : i32, i32, i32
  }
}

</mosaic_0001>

<bundles_post_ra>
// kernel: gamenet_forward.1
= control target key start
LH: loop header
LB: loop body
LE: loop exit
PB: predicated region body
PF: predicated region fallthrough
CT: control target
= control target key end

     0   :  { %s2654_s0 = inlined_call_operand.vmem [shape: f32[2,4,128], index: 0, kind: input, shape index: {}]   ;;  %s2655_s1 = inlined_call_operand.vmem [shape: f32[9,1,128], index: 1, kind: input, shape index: {}]   ;;  %s2656_s2 = inlined_call_operand.vmem [shape: f32[16,4], index: 2, kind: input, shape index: {}]   ;;  %s2657_s3 = inlined_call_operand.vmem [shape: f32[16,1], index: 3, kind: input, shape index: {}]   ;;  %s2658_s4 = inlined_call_operand.vmem [shape: f32[6,16,144], index: 4, kind: input, shape index: {}]   ;;  %s2659_s5 = inlined_call_operand.vmem [shape: f32[6,16,1], index: 5, kind: input, shape index: {}]   ;;  %s2660_s6 = inlined_call_operand.vmem [shape: f32[3,16], index: 6, kind: input, shape index: {}]   ;;  %s2661_s7 = inlined_call_operand.vmem [shape: f32[3,1], index: 7, kind: input, shape index: {}]   ;;  %s2662_s8 = inlined_call_operand.vmem [shape: f32[128,64], index: 8, kind: input, shape index: {}]   ;;  %s2663_s9 = inlined_call_operand.vmem [shape: f32[128,64], index: 9, kind: input, shape index: {}]   ;;  %s2664_s10 = inlined_call_operand.vmem [shape: f32[1,64], index: 10, kind: input, shape index: {}]   ;;  %s2665_s11 = inlined_call_operand.vmem [shape: f32[128,64], index: 11, kind: input, shape index: {}]   ;;  %s2666_s12 = inlined_call_operand.vmem [shape: f32[1,64], index: 12, kind: input, shape index: {}]   ;;  %s2667_s13 = inlined_call_operand.vmem [shape: f32[64,1], index: 13, kind: input, shape index: {}]   ;;  %s2668_s14 = inlined_call_operand.<no memory space> [shape: f32[1,1], index: 14, kind: input, shape index: {}]   ;;  %s2669_s15 = inlined_call_operand.hbm [shape: f32[2,1,64], index: 15, kind: output, shape index: {0}]   ;;  %s2670_s16 = inlined_call_operand.vmem [shape: f32[2,1,1], index: 16, kind: output, shape index: {1}]  }
   0x1   :  { %2695 = sst [smem:[#allocation13_spill]] %s2654_s0  ;;  %v22_v0 = vstv %s2668_s14 }
   0x2   :  { %2696 = sst [smem:[#allocation14_spill]] %s2655_s1  ;;  %23 = vst [vmem:[#allocation2] sm:$0x1] %v22_v0 }
   0x3   :  { %2697 = sst [smem:[#allocation15_spill]] %s2656_s2 }
   0x4   :  { %2698 = sst [smem:[#allocation16_spill]] %s2657_s3 }
   0x5   :  { %24 = vsyncpa [#allocation4], 0 }
   0x6   :  { %26 = vsyncpa [#allocation4 + $0x1], 0  ;;  %s1925_s23 = smov 0   ;;  %s1927_s24 = smov 0  }
   0x7   :  { %s1929_s25 = smov 0   ;;  %s1931_s26 = smov 0  }
   0x8 LB: > { %2699 = sst [smem:[#allocation6_spill]] %s1814_s23  ;;  %s1946_s14 = sadd.s32 4294967295, %s1826_s26   ;;  %s1826_s26 = sphi %s1931_s26, %s2724_s26   ;;  %s1822_s25 = sphi %s1929_s25, %s2726_s25   ;;  %s1818_s24 = sphi %s1927_s24, %s2728_s24   ;;  %s1814_s23 = sphi %s1925_s23, %s2727_s23  }
   0x9   : > { %2700 = sst [smem:[#allocation7_spill]] %s1822_s25  ;;  %s1644_s27 = sadd.s32 4294967294, %s1826_s26  }
   0xa   : > { %2701 = sst [smem:[#allocation8_spill]] %s1826_s26  ;;  %s1950_s28 = sadd.s32 1, %s1826_s26  }
   0xb   : > { %2702 = sst [smem:[#allocation9_spill]] %s1950_s28  ;;  %s359_s29 = sadd.s32 1, %s1822_s25 }
   0xc   : > { %s356_s30 = ssub.s32 %s1826_s26, %s1950_s28  ;;  %p369_p0 = scmp.ne.s32.totalorder %s1822_s25, %s1818_s24 }
   0xd   : > { %p357_p1 = scmp.eq.s32.totalorder %s356_s30, 0  ;;  %p370_p2 = scmp.eq.s32.totalorder %s1946_s14, 1 }
   0xe   : > { %p375_p3 = scmp.ne.s32.totalorder %s1818_s24, %s1814_s23  ;;  %p376_p4 = scmp.eq.s32.totalorder %s1644_s27, 1 }
   0xf   : > { %s1961_s0 = scalar_select %p357_p1, %s1822_s25, %s359_s29  }
  0x10   : > { %p1963_p5 = por %p370_p2, %p369_p0  ;;  %p1967_p6 = por %p376_p4, %p375_p3 }
  0x11   : > { %2703 = sst [smem:[#allocation10_spill]] %s1961_s0  ;;  %p1647_p7 = scmp.ge.s32.totalorder %s1826_s26, 1 }
  0x12   : > { %s2704_s17 = scalar_select %p1963_p5, 1, 0 }
  0x13   : > { %s2706_s18 = scalar_select %p1967_p6, 1, 0 }
  0x14   : > { %2705 = sst [smem:[#allocation11_spill]] %s2704_s17  ;;  %p469_p8 = scmp.lt.s32.totalorder %s1826_s26, 3 }
  0x15   : > { %2707 = sst [smem:[#allocation12_spill]] %s2706_s18 }
  0x16   : > { %p470_p9 = pnand %p1647_p7, %p469_p8 }
  0x17   : > { %s2708_s3 = sld [smem:[#allocation16_spill]] (!%p470_p9)  ;;  %p520_p10 = scmp.lt.s32.totalorder (!%p470_p9), %s1946_s14, 1 }
  0x18   : > { %473 = sbr.rel (%p470_p9) target bundleno = 2454 (0x996), region = 80  ;;  %s2709_s30 = sld [smem:[#allocation13_spill]] (!%p470_p9) }
  0x19   : > { %s2710_s2 = sld [smem:[#allocation15_spill]] (!%p470_p9)  ;;  %s2690_s25 = smov (!%p470_p9), 119  }
  0x1a   : > { %s2682_s23 = smov (!%p470_p9), 127   ;;  %s2686_s28 = smov (!%p470_p9), 1  }
  0x1b   : > { %s2684_s18 = smov (!%p470_p9), 9   ;;  %s2678_s27 = smov (!%p470_p9), 117  }
  0x1c   : > { %s2680_s19 = smov (!%p470_p9), 11   ;;  %s2711_s1 = sld [smem:[#allocation14_spill]] (!%p470_p9) }
  0x1d   : > { %v540_v1 = vld [vmem:[%s2708_s3 + $0x8] sm:$0xff]  ;;  %v1828_v2 = vmov 0   ;;  %s1978_s21 = scalar_select %p520_p10, %s1946_s14, 1  ;;  %vm558_vm0 = vcmask 1043456   ;;  %vm551_vm1 = vcmask 31744   ;;  %v539_v5 = vld [vmem:[%s2708_s3] sm:$0xff] }
  0x1e   : > { %1746 = vset.pattern.permute.xlu0 %v1828_v2  ;;  %1747 = vset.pattern.permute.xlu1 %v1828_v2  ;;  %v592_v15 = vld [vmem:[%s2659_s5 + $0x8] sm:$0xff]  ;;  %v591_v37 = vld [vmem:[%s2659_s5] sm:$0xff]  ;;  %vm680_vm2 = vcmask 130048   ;;  %v590_v62 = vld [vmem:[%s2658_s4 + $0x18] sm:$0xff]  ;;  %s2712_s29 = smov 10   ;;  %s2717_s20 = smov 9  }
  0x1f   : > { %548 = vperm.xlu0 %1746, %v540_v1   ;;  %1748 = vset.pattern.permute.xlu2 %v1828_v2  ;;  %s1648_s22 = sshll.u32 %s1978_s21, 2  ;;  %v537_v3 = vld [vmem:[%s2710_s2] sm:$0xff]  ;;  %v538_v6 = vld [vmem:[%s2710_s2 + $0x8] sm:$0xff]  ;;  %v589_v63 = vld [vmem:[%s2658_s4 + $0x10] sm:$0xff]  ;;  %vm1522_vm3 = vcmask 523264   ;;  %vm1459_vm4 = vcmask 516096  }
  0x20   : > { %s523_s0 = scalar_lea.vmem %s2709_s30, %s1648_s22  ;;  %s2676_s22 = smov 10   ;;  %v588_v55 = vld [vmem:[%s2658_s4 + $0x8] sm:$0xff]  ;;  %v587_v61 = vld [vmem:[%s2658_s4] sm:$0xff]  ;;  %vm1549_vm5 = vcmask 0  }
  0x21   : > { %v527_v4 = vld [vmem:[%s523_s0] sm:$0xf]  ;;  %s2688_s0 = smov 118   ;;  %s2713_s30 = smov 11  }
  0x22   : > { %1649 = vmatpush.msk.msra.mxu0 %vm558_vm0, %v527_v4  ;;  %v2035_v19 = vld [vmem:[%s2711_s1 + $0x7] ss:$0 sm:$0xff]  ;;  %v2041_v24 = vld [vmem:[%s2711_s1 + $0x6] ss:$0 sm:$0xff]  ;;  %v2048_v27 = vld [vmem:[%s2711_s1 + $0x5] ss:$0 sm:$0xff] }
  0x23   : > { %1650 = vmatmul.msk.f32.vlgmr.msra.gmra.mxu0 %vm551_vm1, %v537_v3  ;;  %v2056_v33 = vld [vmem:[%s2711_s1 + $0x4] ss:$0 sm:$0xff]  ;;  %v2061_v35 = vld [vmem:[%s2711_s1 + $0x3] ss:$0 sm:$0xff]  ;;  %v2074_v42 = vld [vmem:[%s2711_s1 + $0x2] ss:$0 sm:$0xff] }
  0x24   : > { %v2081_v45 = vld [vmem:[%s2711_s1 + $0x8] ss:$0 sm:$0xff]  ;;  %v2087_v48 = vld [vmem:[%s2711_s1 + $0x1] ss:$0 sm:$0xff]  ;;  %v2100_v56 = vld [vmem:[%s2711_s1] ss:$0 sm:$0xff] }
  0x25   : > { %s2718_s1 = smov 119  }
  0x27   : > { %543 = vperm.xlu0 %1746, %v539_v5  }
  0x2b   : > { %1651 = vmatmul.msk.f32.gmra.mxu0 %vm551_vm1, %v538_v6 }
  0x91   : > { %v549_v7 = vpop.permute.xlu0 %548 }
  0x99   : > { %v544_v8 = vpop.permute.xlu0 %543 }
  0xa0   : > { %v579_v9 = vpop.f32.mrf.mxu0 }
  0xa1   : > { %v580_v10 = vadd.f32 %v579_v9, %v544_v8 }
  0xa3   : > { %v1993_v11 = vmax.f32 %v580_v10, 0.0 }
  0xa5   : > { %643 = vrot.lane.b32.xlu2 %v1993_v11, %s2690_s25  ;;  %652 = vrot.lane.b32.xlu1 %v1993_v11, %s2688_s0  ;;  %v632_v39 = vmul.f32 %v2056_v33, %v1993_v11 }
  0xa8   : > { %v582_v12 = vpop.f32.mrf.mxu0 }
  0xa9   : > { %v583_v13 = vadd.f32 %v582_v12, %v549_v7 }
  0xab   : > { %v1999_v14 = vmax.f32 %v583_v13, 0.0  ;;  %v1659_v13 = vld [vmem:[%s2659_s5 + $0x18] sm:$0xff] }
  0xad   : > { %636 = vrot.lane.b32.xlu0 %v1999_v14, %s2682_s23  ;;  %645 = vrot.lane.b32.xlu2 %v1999_v14, %s2690_s25  ;;  %v633_v36 = vmul.f32 %v2056_v33, %v1999_v14 }
  0xae   : > { %654 = vrot.lane.b32.xlu1 %v1999_v14, %s2688_s0 }
  0xb5   : > { %620 = vrot.lane.b32.xlu0 %v1993_v11, %s2686_s28  ;;  %611 = vrot.lane.b32.xlu2 %v1993_v11, %s2684_s18 }
  0xb6   : > { %634 = vrot.lane.b32.xlu1 %v1993_v11, %s2682_s23 }
  0xbd   : > { %604 = vrot.lane.b32.xlu0 %v1999_v14, %s2676_s22  ;;  %622 = vrot.lane.b32.xlu2 %v1999_v14, %s2686_s28 }
  0xbe   : > { %613 = vrot.lane.b32.xlu1 %v1999_v14, %s2684_s18 }
  0xc5   : > { %661 = vrot.lane.b32.xlu0 %v1993_v11, %s2678_s27  ;;  %602 = vrot.lane.b32.xlu2 %v1993_v11, %s2676_s22 }
  0xc6   : > { %663 = vrot.lane.b32.xlu1 %v1999_v14, %s2678_s27  ;;  %s2714_s27 = smov 117  }
  0xcd   : > { %677 = vperm.xlu0 %1746, %v592_v15   ;;  %593 = vrot.lane.b32.xlu2 %v1993_v11, %s2680_s19  ;;  %v1658_v15 = vld [vmem:[%s2659_s5 + $0x10] sm:$0xff] }
  0xce   : > { %595 = vrot.lane.b32.xlu1 %v1999_v14, %s2680_s19  ;;  %s1563_s19 = scalar_lea.hbm %s2669_s15, %s1946_s14 }
  0xcf   : > { %s1567_s26 = sshll.u32 %s1563_s19, 4  ;;  %s1568_s26 = int_to_ptr.hbm [resolvable:$true] %s1567_s26 }
  0xd0   : > { %s1778_s17 = sshra.s32 %s1568_s26, 4  ;;  %s1779_s17 = int_to_ptr.hbm [resolvable:$true] %s1778_s17 }
  0xd1   : > { %p1785_p0 = scmp.lt.s32.totalorder %s1779_s17, %s2669_s15 }
  0xd6   : > { %672 = vperm.xlu1 %1747, %v591_v37  }
  0xff   : > { %v644_v16 = vpop.permute.xlu2 %643 }
 0x100   : > { %v650_v28 = vmul.f32 %v2041_v24, %v644_v16 }
 0x107   : > { %v646_v18 = vpop.permute.xlu2 %645 }
 0x108   : > { %v651_v26 = vmul.f32 %v2041_v24, %v646_v18 }
 0x10f   : > { %v612_v23 = vpop.permute.xlu2 %611 }
 0x110   : > { %v618_v47 = vmul.f32 %v2074_v42, %v612_v23 }
 0x117   : > { %v653_v17 = vpop.permute.xlu1 %652  ;;  %v623_v34 = vpop.permute.xlu2 %622 }
 0x118   : > { %v659_v25 = vmul.f32 %v2035_v19, %v653_v17  ;;  %v628_v41 = vmul.f32 %v2061_v35, %v623_v34 }
 0x11f   : > { %v637_v20 = vpop.permute.xlu0 %636  ;;  %v603_v46 = vpop.permute.xlu2 %602 }
 0x120   : > { %v655_v21 = vpop.permute.xlu1 %654  ;;  %v642_v31 = vmul.f32 %v2048_v27, %v637_v20  ;;  %v609_v53 = vmul.f32 %v2087_v48, %v603_v46 }
 0x121   : > { %v660_v22 = vmul.f32 %v2035_v19, %v655_v21 }
 0x123   : > { %687 = vmatpush.msra.mxu1 %v660_v22 }
 0x125   : > { %688 = vmatpush.msra.mxu1 %v659_v25 }
 0x127   : > { %689 = vmatpush.msra.mxu1 %v651_v26  ;;  %v621_v29 = vpop.permute.xlu0 %620  ;;  %v594_v57 = vpop.permute.xlu2 %593 }
 0x128   : > { %v635_v30 = vpop.permute.xlu1 %634  ;;  %v627_v43 = vmul.f32 %v2061_v35, %v621_v29  ;;  %v600_v60 = vmul.f32 %v2100_v56, %v594_v57 }
 0x129   : > { %690 = vmatpush.msra.mxu1 %v650_v28  ;;  %v641_v32 = vmul.f32 %v2048_v27, %v635_v30 }
 0x12b   : > { %691 = vmatpush.msra.mxu1 %v642_v31 }
 0x12d   : > { %692 = vmatpush.msra.mxu1 %v641_v32 }
 0x12f   : > { %693 = vmatpush.msra.mxu1 %v633_v36  ;;  %v605_v38 = vpop.permute.xlu0 %604 }
 0x130   : > { %v614_v40 = vpop.permute.xlu1 %613  ;;  %v610_v51 = vmul.f32 %v2087_v48, %v605_v38 }
 0x131   : > { %694 = vmatpush.msra.mxu1 %v632_v39  ;;  %v619_v44 = vmul.f32 %v2074_v42, %v614_v40 }
 0x133   : > { %695 = vmatpush.msra.mxu1 %v628_v41 }
 0x135   : > { %696 = vmatpush.msra.mxu1 %v627_v43 }
 0x137   : > { %697 = vmatpush.msra.mxu1 %v619_v44  ;;  %v662_v49 = vpop.permute.xlu0 %661 }
 0x138   : > { %v664_v50 = vpop.permute.xlu1 %663  ;;  %v668_v54 = vmul.f32 %v2081_v45, %v662_v49 }
 0x139   : > { %698 = vmatpush.msra.mxu1 %v618_v47  ;;  %v669_v52 = vmul.f32 %v2081_v45, %v664_v50 }
 0x13b   : > { %699 = vmatpush.msra.mxu1 %v610_v51  ;;  %724 = vmatpush.msra.mxu2 %v669_v52 }
 0x13d   : > { %700 = vmatpush.msra.mxu1 %v609_v53  ;;  %725 = vmatpush.msra.mxu2 %v668_v54  ;;  %v1654_v54 = vld [vmem:[%s2658_s4 + $0x20] sm:$0xff] }
 0x13e   : > { %1652 = vmatmul.msk.f32.vlgmr.msra.gmra.mxu2 %vm680_vm2, %v588_v55 }
 0x13f   : > { %v678_v6 = vpop.permute.xlu0 %677 }
 0x140   : > { %v596_v58 = vpop.permute.xlu1 %595 }
 0x141   : > { %v601_v59 = vmul.f32 %v2100_v56, %v596_v58 }
 0x143   : > { %701 = vmatpush.msra.mxu1 %v601_v59 }
 0x145   : > { %702 = vmatpush.msra.mxu1 %v600_v60  ;;  %v1655_v60 = vld [vmem:[%s2658_s4 + $0x28] sm:$0xff] }
 0x146   : > { %703 = vmatmul.f32.vlgmr.msra.gmra.mxu1 %v587_v61  ;;  %1653 = vmatmul.msk.f32.gmra.mxu2 %vm680_vm2, %v590_v62  ;;  %v1656_v61 = vld [vmem:[%s2658_s4 + $0x30] sm:$0xff]  ;;  %v1657_v62 = vld [vmem:[%s2658_s4 + $0x38] sm:$0xff] }
 0x148   : > { %v673_v0 = vpop.permute.xlu1 %672 }
 0x14e   : > { %706 = vmatmul.f32.gmra.mxu1 %v589_v63 }
 0x1c1   : > { %v727_v1 = vpop.f32.mrf.mxu2 }
 0x1c3   : > { %v704_v2 = vpop.f32.mrf.mxu1 }
 0x1c4   : > { %v705_v3 = vadd.f32 %v704_v2, %v673_v0 }
 0x1c6   : > { %v728_v4 = vadd.f32 %v727_v1, %v705_v3 }
 0x1c8   : > { %v733_v5 = vmax.f32 %v728_v4, 0.0 }
 0x1c9   : > { %v730_v8 = vpop.f32.mrf.mxu2 }
 0x1ca   : > { %781 = vrot.lane.b32.xlu0 %v733_v5, %s2688_s0  ;;  %v767_v37 = vmul.f32 %v2056_v33, %v733_v5 }
 0x1cb   : > { %v707_v7 = vpop.f32.mrf.mxu1 }
 0x1cc   : > { %v708_v9 = vadd.f32 %v707_v7, %v678_v6 }
 0x1ce   : > { %v731_v10 = vadd.f32 %v730_v8, %v708_v9 }
 0x1d0   : > { %v734_v12 = vmax.f32 %v731_v10, 0.0 }
 0x1d2   : > { %777 = vrot.lane.b32.xlu1 %v734_v12, %s2690_s25  ;;  %783 = vrot.lane.b32.xlu2 %v734_v12, %s2688_s0  ;;  %v768_v34 = vmul.f32 %v2056_v33, %v734_v12 }
 0x1d3   : > { %771 = vrot.lane.b32.xlu0 %v734_v12, %s2682_s23 }
 0x1da   : > { %769 = vrot.lane.b32.xlu1 %v733_v5, %s2682_s23  ;;  %775 = vrot.lane.b32.xlu2 %v733_v5, %s2690_s25 }
 0x1db   : > { %761 = vrot.lane.b32.xlu0 %v733_v5, %s2686_s28 }
 0x1e2   : > { %757 = vrot.lane.b32.xlu1 %v734_v12, %s2684_s18  ;;  %763 = vrot.lane.b32.xlu2 %v734_v12, %s2686_s28  ;;  %s2715_s28 = smov 127  }
 0x1e3   : > { %751 = vrot.lane.b32.xlu0 %v734_v12, %s2712_s29 }
 0x1ea   : > { %749 = vrot.lane.b32.xlu1 %v733_v5, %s2712_s29  ;;  %755 = vrot.lane.b32.xlu2 %v733_v5, %s2684_s18  ;;  %s2716_s18 = smov 1  }
 0x1eb   : > { %743 = vrot.lane.b32.xlu0 %v733_v5, %s2713_s30 }
 0x1f2   : > { %789 = vrot.lane.b32.xlu1 %v734_v12, %s2714_s27  ;;  %745 = vrot.lane.b32.xlu2 %v734_v12, %s2713_s30 }
 0x1f3   : > { %800 = vperm.xlu0 %1746, %v1659_v13  }
 0x1fa   : > { %795 = vperm.xlu1 %1747, %v1658_v15   ;;  %787 = vrot.lane.b32.xlu2 %v733_v5, %s2714_s27 }
 0x22c   : > { %v784_v16 = vpop.permute.xlu2 %783 }
 0x22d   : > { %v786_v17 = vmul.f32 %v2035_v19, %v784_v16 }
 0x22f   : > { %809 = vmatpush.msra.mxu3 %v786_v17 }
 0x234   : > { %v776_v18 = vpop.permute.xlu2 %775 }
 0x235   : > { %v779_v28 = vmul.f32 %v2041_v24, %v776_v18 }
 0x23c   : > { %v782_v20 = vpop.permute.xlu0 %781  ;;  %v764_v26 = vpop.permute.xlu2 %763 }
 0x23d   : > { %v785_v21 = vmul.f32 %v2035_v19, %v782_v20  ;;  %v766_v38 = vmul.f32 %v2061_v35, %v764_v26 }
 0x23f   : > { %810 = vmatpush.msra.mxu3 %v785_v21 }
 0x244   : > { %v778_v22 = vpop.permute.xlu1 %777  ;;  %v756_v36 = vpop.permute.xlu2 %755 }
 0x245   : > { %v780_v23 = vmul.f32 %v2041_v24, %v778_v22  ;;  %v772_v25 = vpop.permute.xlu0 %771  ;;  %v759_v44 = vmul.f32 %v2074_v42, %v756_v36 }
 0x246   : > { %v774_v29 = vmul.f32 %v2048_v27, %v772_v25 }
 0x247   : > { %811 = vmatpush.msra.mxu3 %v780_v23 }
 0x249   : > { %812 = vmatpush.msra.mxu3 %v779_v28 }
 0x24b   : > { %813 = vmatpush.msra.mxu3 %v774_v29 }
 0x24c   : > { %v770_v30 = vpop.permute.xlu1 %769  ;;  %v746_v46 = vpop.permute.xlu2 %745 }
 0x24d   : > { %v773_v31 = vmul.f32 %v2048_v27, %v770_v30  ;;  %v762_v32 = vpop.permute.xlu0 %761  ;;  %v748_v52 = vmul.f32 %v2100_v56, %v746_v46 }
 0x24e   : > { %v765_v40 = vmul.f32 %v2061_v35, %v762_v32 }
 0x24f   : > { %814 = vmatpush.msra.mxu3 %v773_v31 }
 0x251   : > { %815 = vmatpush.msra.mxu3 %v768_v34 }
 0x253   : > { %816 = vmatpush.msra.mxu3 %v767_v37 }
 0x254   : > { %v758_v39 = vpop.permute.xlu1 %757  ;;  %v788_v55 = vpop.permute.xlu2 %787 }
 0x255   : > { %v752_v41 = vpop.permute.xlu0 %751  ;;  %817 = vmatpush.msra.mxu3 %v766_v38  ;;  %v760_v43 = vmul.f32 %v2074_v42, %v758_v39  ;;  %v791_v59 = vmul.f32 %v2081_v45, %v788_v55 }
 0x256   : > { %v754_v47 = vmul.f32 %v2087_v48, %v752_v41 }
 0x257   : > { %818 = vmatpush.msra.mxu3 %v765_v40 }
 0x259   : > { %819 = vmatpush.msra.mxu3 %v760_v43 }
 0x25b   : > { %820 = vmatpush.msra.mxu3 %v759_v44 }
 0x25c   : > { %v750_v49 = vpop.permute.xlu1 %749 }
 0x25d   : > { %v753_v50 = vmul.f32 %v2087_v48, %v750_v49  ;;  %821 = vmatpush.msra.mxu3 %v754_v47  ;;  %v744_v51 = vpop.permute.xlu0 %743 }
 0x25e   : > { %v747_v53 = vmul.f32 %v2100_v56, %v744_v51 }
 0x25f   : > { %822 = vmatpush.msra.mxu3 %v753_v50 }
 0x261   : > { %823 = vmatpush.msra.mxu3 %v748_v52 }
 0x263   : > { %824 = vmatpush.msra.mxu3 %v747_v53  ;;  %v1662_v53 = vld [vmem:[%s2658_s4 + $0x40] sm:$0xff] }
 0x264   : > { %v790_v57 = vpop.permute.xlu1 %789  ;;  %825 = vmatmul.f32.vlgmr.msra.gmra.mxu3 %v1654_v54 }
 0x265   : > { %v792_v58 = vmul.f32 %v2081_v45, %v790_v57  ;;  %v801_v5 = vpop.permute.xlu0 %800 }
 0x267   : > { %846 = vmatpush.msrb.mxu0 %v792_v58 }
 0x269   : > { %847 = vmatpush.msrb.mxu0 %v791_v59  ;;  %v1663_v59 = vld [vmem:[%s2658_s4 + $0x48] sm:$0xff] }
 0x26a   : > { %1660 = vmatmul.msk.f32.vlgmr.msrb.gmra.mxu0 %vm680_vm2, %v1655_v60  ;;  %v1664_v60 = vld [vmem:[%s2658_s4 + $0x50] sm:$0xff] }
 0x26c   : > { %828 = vmatmul.f32.gmra.mxu3 %v1656_v61  ;;  %v796_v63 = vpop.permute.xlu1 %795  ;;  %v1665_v61 = vld [vmem:[%s2658_s4 + $0x58] sm:$0xff] }
 0x272   : > { %1661 = vmatmul.msk.f32.gmra.mxu0 %vm680_vm2, %v1657_v62 }
 0x2e7   : > { %v826_v0 = vpop.f32.mrf.mxu3  ;;  %v849_v1 = vpop.f32.mrf.mxu0 }
 0x2e8   : > { %v827_v2 = vadd.f32 %v826_v0, %v796_v63 }
 0x2ea   : > { %v850_v3 = vadd.f32 %v849_v1, %v827_v2 }
 0x2ec   : > { %v855_v4 = vadd.f32 %v850_v3, %v1993_v11  ;;  %v1667_v11 = vld [vmem:[%s2659_s5 + $0x28] sm:$0xff] }
 0x2ee   : > { %v2169_v6 = vmax.f32 %v855_v4, 0.0 }
 0x2ef   : > { %v829_v7 = vpop.f32.mrf.mxu3  ;;  %v852_v8 = vpop.f32.mrf.mxu0 }
 0x2f0   : > { %v830_v9 = vadd.f32 %v829_v7, %v801_v5  ;;  %905 = vrot.lane.b32.xlu0 %v2169_v6, %s2688_s0  ;;  %v891_v36 = vmul.f32 %v2056_v33, %v2169_v6 }
 0x2f2   : > { %v853_v10 = vadd.f32 %v852_v8, %v830_v9 }
 0x2f4   : > { %v856_v12 = vadd.f32 %v853_v10, %v1999_v14  ;;  %v1666_v14 = vld [vmem:[%s2659_s5 + $0x20] sm:$0xff] }
 0x2f6   : > { %v2174_v13 = vmax.f32 %v856_v12, 0.0  ;;  %v1674_v12 = vld [vmem:[%s2659_s5 + $0x30] sm:$0xff] }
 0x2f8   : > { %901 = vrot.lane.b32.xlu1 %v2174_v13, %s2690_s25  ;;  %907 = vrot.lane.b32.xlu2 %v2174_v13, %s2688_s0  ;;  %v892_v32 = vmul.f32 %v2056_v33, %v2174_v13 }
 0x2f9   : > { %895 = vrot.lane.b32.xlu0 %v2174_v13, %s2715_s28 }
 0x300   : > { %893 = vrot.lane.b32.xlu1 %v2169_v6, %s2715_s28  ;;  %899 = vrot.lane.b32.xlu2 %v2169_v6, %s2690_s25  ;;  %s2719_s25 = smov 118  }
 0x301   : > { %885 = vrot.lane.b32.xlu0 %v2169_v6, %s2716_s18 }
 0x308   : > { %881 = vrot.lane.b32.xlu1 %v2174_v13, %s2717_s20  ;;  %887 = vrot.lane.b32.xlu2 %v2174_v13, %s2716_s18 }
 0x309   : > { %875 = vrot.lane.b32.xlu0 %v2174_v13, %s2712_s29 }
 0x310   : > { %873 = vrot.lane.b32.xlu1 %v2169_v6, %s2712_s29  ;;  %879 = vrot.lane.b32.xlu2 %v2169_v6, %s2717_s20 }
 0x311   : > { %867 = vrot.lane.b32.xlu0 %v2169_v6, %s2713_s30 }
 0x318   : > { %913 = vrot.lane.b32.xlu1 %v2174_v13, %s2714_s27  ;;  %869 = vrot.lane.b32.xlu2 %v2174_v13, %s2713_s30 }
 0x319   : > { %924 = vperm.xlu0 %1746, %v1667_v11   ;;  %v1675_v11 = vld [vmem:[%s2659_s5 + $0x38] sm:$0xff] }
 0x320   : > { %919 = vperm.xlu1 %1747, %v1666_v14   ;;  %911 = vrot.lane.b32.xlu2 %v2169_v6, %s2714_s27 }
 0x352   : > { %v908_v15 = vpop.permute.xlu2 %907 }
 0x353   : > { %v910_v16 = vmul.f32 %v2035_v19, %v908_v15 }
 0x355   : > { %933 = vmatpush.msrb.mxu2 %v910_v16 }
 0x35a   : > { %v900_v17 = vpop.permute.xlu2 %899 }
 0x35b   : > { %v903_v26 = vmul.f32 %v2041_v24, %v900_v17 }
 0x362   : > { %v906_v18 = vpop.permute.xlu0 %905  ;;  %v888_v25 = vpop.permute.xlu2 %887 }
 0x363   : > { %v909_v20 = vmul.f32 %v2035_v19, %v906_v18  ;;  %v890_v37 = vmul.f32 %v2061_v35, %v888_v25 }
 0x365   : > { %934 = vmatpush.msrb.mxu2 %v909_v20 }
 0x36a   : > { %v902_v21 = vpop.permute.xlu1 %901  ;;  %v880_v34 = vpop.permute.xlu2 %879 }
 0x36b   : > { %v904_v22 = vmul.f32 %v2041_v24, %v902_v21  ;;  %v896_v23 = vpop.permute.xlu0 %895  ;;  %v883_v43 = vmul.f32 %v2074_v42, %v880_v34 }
 0x36c   : > { %v898_v28 = vmul.f32 %v2048_v27, %v896_v23 }
 0x36d   : > { %935 = vmatpush.msrb.mxu2 %v904_v22 }
 0x36f   : > { %936 = vmatpush.msrb.mxu2 %v903_v26 }
 0x371   : > { %937 = vmatpush.msrb.mxu2 %v898_v28 }
 0x372   : > { %v894_v29 = vpop.permute.xlu1 %893  ;;  %v870_v44 = vpop.permute.xlu2 %869 }
 0x373   : > { %v897_v30 = vmul.f32 %v2048_v27, %v894_v29  ;;  %v886_v31 = vpop.permute.xlu0 %885  ;;  %v872_v51 = vmul.f32 %v2100_v56, %v870_v44 }
 0x374   : > { %v889_v39 = vmul.f32 %v2061_v35, %v886_v31 }
 0x375   : > { %938 = vmatpush.msrb.mxu2 %v897_v30 }
 0x377   : > { %939 = vmatpush.msrb.mxu2 %v892_v32 }
 0x379   : > { %940 = vmatpush.msrb.mxu2 %v891_v36 }
 0x37a   : > { %v882_v38 = vpop.permute.xlu1 %881  ;;  %v912_v54 = vpop.permute.xlu2 %911 }
 0x37b   : > { %v876_v40 = vpop.permute.xlu0 %875  ;;  %941 = vmatpush.msrb.mxu2 %v890_v37  ;;  %v884_v41 = vmul.f32 %v2074_v42, %v882_v38  ;;  %v915_v58 = vmul.f32 %v2081_v45, %v912_v54 }
 0x37c   : > { %v878_v46 = vmul.f32 %v2087_v48, %v876_v40 }
 0x37d   : > { %942 = vmatpush.msrb.mxu2 %v889_v39 }
 0x37f   : > { %943 = vmatpush.msrb.mxu2 %v884_v41 }
 0x381   : > { %944 = vmatpush.msrb.mxu2 %v883_v43 }
 0x382   : > { %v874_v47 = vpop.permute.xlu1 %873 }
 0x383   : > { %v877_v49 = vmul.f32 %v2087_v48, %v874_v47  ;;  %945 = vmatpush.msrb.mxu2 %v878_v46  ;;  %v868_v50 = vpop.permute.xlu0 %867 }
 0x384   : > { %v871_v52 = vmul.f32 %v2100_v56, %v868_v50 }
 0x385   : > { %946 = vmatpush.msrb.mxu2 %v877_v49 }
 0x387   : > { %947 = vmatpush.msrb.mxu2 %v872_v51 }
 0x389   : > { %948 = vmatpush.msrb.mxu2 %v871_v52 }
 0x38a   : > { %v914_v55 = vpop.permute.xlu1 %913  ;;  %949 = vmatmul.f32.vlgmr.msrb.gmra.mxu2 %v1662_v53 }
 0x38b   : > { %v916_v57 = vmul.f32 %v2081_v45, %v914_v55  ;;  %v925_v4 = vpop.permute.xlu0 %924  ;;  %v1671_v55 = vld [vmem:[%s2658_s4 + $0x68] sm:$0xff] }
 0x38d   : > { %970 = vmatpush.msra.mxu0 %v916_v57 }
 0x38f   : > { %971 = vmatpush.msra.mxu0 %v915_v58  ;;  %v1670_v58 = vld [vmem:[%s2658_s4 + $0x60] sm:$0xff] }
 0x390   : > { %1668 = vmatmul.msk.f32.vlgmr.msra.gmra.mxu0 %vm680_vm2, %v1663_v59  ;;  %v1673_v59 = vld [vmem:[%s2658_s4 + $0x78] sm:$0xff] }
 0x392   : > { %952 = vmatmul.f32.gmra.mxu2 %v1664_v60  ;;  %v920_v62 = vpop.permute.xlu1 %919  ;;  %v1672_v60 = vld [vmem:[%s2658_s4 + $0x70] sm:$0xff] }
 0x398   : > { %1669 = vmatmul.msk.f32.gmra.mxu0 %vm680_vm2, %v1665_v61 }
 0x40d   : > { %v950_v63 = vpop.f32.mrf.mxu2  ;;  %v973_v0 = vpop.f32.mrf.mxu0 }
 0x40e   : > { %v951_v1 = vadd.f32 %v950_v63, %v920_v62 }
 0x410   : > { %v974_v2 = vadd.f32 %v973_v0, %v951_v1 }
 0x412   : > { %v979_v3 = vmax.f32 %v974_v2, 0.0 }
 0x414   : > { %1015 = vrot.lane.b32.xlu1 %v979_v3, %s2715_s28  ;;  %1021 = vrot.lane.b32.xlu2 %v979_v3, %s2718_s1  ;;  %v1013_v36 = vmul.f32 %v2056_v33, %v979_v3 }
 0x415   : > { %1027 = vrot.lane.b32.xlu0 %v979_v3, %s2719_s25  ;;  %v953_v5 = vpop.f32.mrf.mxu2  ;;  %v976_v7 = vpop.f32.mrf.mxu0 }
 0x416   : > { %v954_v8 = vadd.f32 %v953_v5, %v925_v4 }
 0x418   : > { %v977_v9 = vadd.f32 %v976_v7, %v954_v8 }
 0x41a   : > { %v980_v10 = vmax.f32 %v977_v9, 0.0 }
 0x41c   : > { %1023 = vrot.lane.b32.xlu1 %v980_v10, %s2718_s1  ;;  %1029 = vrot.lane.b32.xlu2 %v980_v10, %s2719_s25  ;;  %v1014_v34 = vmul.f32 %v2056_v33, %v980_v10 }
 0x41d   : > { %1017 = vrot.lane.b32.xlu0 %v980_v10, %s2715_s28 }
 0x424   : > { %1003 = vrot.lane.b32.xlu1 %v980_v10, %s2717_s20  ;;  %1001 = vrot.lane.b32.xlu2 %v979_v3, %s2717_s20 }
 0x425   : > { %1007 = vrot.lane.b32.xlu0 %v979_v3, %s2716_s18 }
 0x42c   : > { %1035 = vrot.lane.b32.xlu1 %v980_v10, %s2714_s27  ;;  %1009 = vrot.lane.b32.xlu2 %v980_v10, %s2716_s18 }
 0x42d   : > { %997 = vrot.lane.b32.xlu0 %v980_v10, %s2712_s29 }
 0x434   : > { %991 = vrot.lane.b32.xlu1 %v980_v10, %s2713_s30  ;;  %995 = vrot.lane.b32.xlu2 %v979_v3, %s2712_s29 }
 0x435   : > { %1033 = vrot.lane.b32.xlu0 %v979_v3, %s2714_s27 }
 0x43c   : > { %1041 = vperm.xlu1 %1747, %v1674_v12   ;;  %989 = vrot.lane.b32.xlu2 %v979_v3, %s2713_s30 }
 0x43d   : > { %1046 = vperm.xlu0 %1746, %v1675_v11  }
 0x46e   : > { %v1022_v14 = vpop.permute.xlu2 %1021 }
 0x46f   : > { %v1025_v26 = vmul.f32 %v2041_v24, %v1022_v14 }
 0x476   : > { %v1030_v15 = vpop.permute.xlu2 %1029 }
 0x477   : > { %v1032_v16 = vmul.f32 %v2035_v19, %v1030_v15 }
 0x479   : > { %1055 = vmatpush.msrb.mxu1 %v1032_v16 }
 0x47e   : > { %v1002_v20 = vpop.permute.xlu2 %1001 }
 0x47f   : > { %v1005_v46 = vmul.f32 %v2074_v42, %v1002_v20 }
 0x486   : > { %v1016_v17 = vpop.permute.xlu1 %1015  ;;  %v1010_v28 = vpop.permute.xlu2 %1009 }
 0x487   : > { %v1028_v18 = vpop.permute.xlu0 %1027  ;;  %v1019_v30 = vmul.f32 %v2048_v27, %v1016_v17  ;;  %v1012_v37 = vmul.f32 %v2061_v35, %v1010_v28 }
 0x488   : > { %v1031_v21 = vmul.f32 %v2035_v19, %v1028_v18 }
 0x48a   : > { %1056 = vmatpush.msrb.mxu1 %v1031_v21 }
 0x48e   : > { %v1024_v22 = vpop.permute.xlu1 %1023  ;;  %v996_v38 = vpop.permute.xlu2 %995 }
 0x48f   : > { %v1026_v23 = vmul.f32 %v2041_v24, %v1024_v22  ;;  %v1018_v25 = vpop.permute.xlu0 %1017  ;;  %v999_v49 = vmul.f32 %v2087_v48, %v996_v38 }
 0x490   : > { %v1020_v29 = vmul.f32 %v2048_v27, %v1018_v25 }
 0x491   : > { %1057 = vmatpush.msrb.mxu1 %v1026_v23 }
 0x493   : > { %1058 = vmatpush.msrb.mxu1 %v1025_v26 }
 0x495   : > { %1059 = vmatpush.msrb.mxu1 %v1020_v29 }
 0x496   : > { %v1004_v31 = vpop.permute.xlu1 %1003  ;;  %v990_v50 = vpop.permute.xlu2 %989 }
 0x497   : > { %v1008_v32 = vpop.permute.xlu0 %1007  ;;  %1060 = vmatpush.msrb.mxu1 %v1019_v30  ;;  %v1006_v41 = vmul.f32 %v2074_v42, %v1004_v31  ;;  %v993_v57 = vmul.f32 %v2100_v56, %v990_v50 }
 0x498   : > { %v1011_v39 = vmul.f32 %v2061_v35, %v1008_v32 }
 0x499   : > { %1061 = vmatpush.msrb.mxu1 %v1014_v34 }
 0x49b   : > { %1062 = vmatpush.msrb.mxu1 %v1013_v36 }
 0x49d   : > { %1063 = vmatpush.msrb.mxu1 %v1012_v37 }
 0x49e   : > { %v1036_v40 = vpop.permute.xlu1 %1035 }
 0x49f   : > { %v1038_v43 = vmul.f32 %v2081_v45, %v1036_v40  ;;  %v998_v44 = vpop.permute.xlu0 %997  ;;  %1064 = vmatpush.msrb.mxu1 %v1011_v39 }
 0x4a0   : > { %v1000_v47 = vmul.f32 %v2087_v48, %v998_v44 }
 0x4a1   : > { %1065 = vmatpush.msrb.mxu1 %v1006_v41  ;;  %1092 = vmatpush.msrb.mxu3 %v1038_v43 }
 0x4a3   : > { %1066 = vmatpush.msrb.mxu1 %v1005_v46 }
 0x4a5   : > { %1067 = vmatpush.msrb.mxu1 %v1000_v47 }
 0x4a6   : > { %v992_v51 = vpop.permute.xlu1 %991 }
 0x4a7   : > { %v994_v52 = vmul.f32 %v2100_v56, %v992_v51  ;;  %v1034_v53 = vpop.permute.xlu0 %1033  ;;  %1068 = vmatpush.msrb.mxu1 %v999_v49 }
 0x4a8   : > { %v1037_v54 = vmul.f32 %v2081_v45, %v1034_v53 }
 0x4a9   : > { %1069 = vmatpush.msrb.mxu1 %v994_v52 }
 0x4aa   : > { %1093 = vmatpush.msrb.mxu3 %v1037_v54  ;;  %v1679_v54 = vld [vmem:[%s2658_s4 + $0x88] sm:$0xff] }
 0x4ab   : > { %1676 = vmatmul.msk.f32.vlgmr.msrb.gmra.mxu3 %vm680_vm2, %v1671_v55  ;;  %1070 = vmatpush.msrb.mxu1 %v993_v57  ;;  %v1678_v57 = vld [vmem:[%s2658_s4 + $0x80] sm:$0xff] }
 0x4ac   : > { %1071 = vmatmul.f32.vlgmr.msrb.gmra.mxu1 %v1670_v58  ;;  %v1681_v58 = vld [vmem:[%s2658_s4 + $0x98] sm:$0xff] }
 0x4ae   : > { %v1042_v62 = vpop.permute.xlu1 %1041 }
 0x4af   : > { %v1047_v5 = vpop.permute.xlu0 %1046 }
 0x4b3   : > { %1677 = vmatmul.msk.f32.gmra.mxu3 %vm680_vm2, %v1673_v59  ;;  %v1680_v59 = vld [vmem:[%s2658_s4 + $0x90] sm:$0xff] }
 0x4b4   : > { %1074 = vmatmul.f32.gmra.mxu1 %v1672_v60 }
 0x529   : > { %v1072_v61 = vpop.f32.mrf.mxu1 }
 0x52a   : > { %v1073_v63 = vadd.f32 %v1072_v61, %v1042_v62 }
 0x52e   : > { %v1095_v0 = vpop.f32.mrf.mxu3 }
 0x52f   : > { %v1096_v1 = vadd.f32 %v1095_v0, %v1073_v63 }
 0x531   : > { %v1101_v2 = vadd.f32 %v1096_v1, %v2169_v6  ;;  %v1075_v3 = vpop.f32.mrf.mxu1  ;;  %v1682_v6 = vld [vmem:[%s2659_s5 + $0x40] sm:$0xff] }
 0x532   : > { %v1076_v7 = vadd.f32 %v1075_v3, %v1047_v5 }
 0x533   : > { %v2301_v4 = vmax.f32 %v1101_v2, 0.0 }
 0x535   : > { %1139 = vrot.lane.b32.xlu1 %v2301_v4, %s2715_s28  ;;  %1145 = vrot.lane.b32.xlu2 %v2301_v4, %s2718_s1  ;;  %v1137_v34 = vmul.f32 %v2056_v33, %v2301_v4 }
 0x536   : > { %1151 = vrot.lane.b32.xlu0 %v2301_v4, %s2719_s25  ;;  %v1098_v8 = vpop.f32.mrf.mxu3 }
 0x537   : > { %v1099_v9 = vadd.f32 %v1098_v8, %v1076_v7 }
 0x539   : > { %v1102_v10 = vadd.f32 %v1099_v9, %v2174_v13  ;;  %v1683_v13 = vld [vmem:[%s2659_s5 + $0x48] sm:$0xff] }
 0x53b   : > { %v2310_v12 = vmax.f32 %v1102_v10, 0.0  ;;  %v1691_v10 = vld [vmem:[%s2659_s5 + $0x58] sm:$0xff] }
 0x53d   : > { %1147 = vrot.lane.b32.xlu1 %v2310_v12, %s2718_s1  ;;  %1153 = vrot.lane.b32.xlu2 %v2310_v12, %s2719_s25  ;;  %v1138_v32 = vmul.f32 %v2056_v33, %v2310_v12 }
 0x53e   : > { %1141 = vrot.lane.b32.xlu0 %v2310_v12, %s2715_s28 }
 0x545   : > { %1127 = vrot.lane.b32.xlu1 %v2310_v12, %s2717_s20  ;;  %1125 = vrot.lane.b32.xlu2 %v2301_v4, %s2717_s20 }
 0x546   : > { %1131 = vrot.lane.b32.xlu0 %v2301_v4, %s2716_s18 }
 0x54d   : > { %1159 = vrot.lane.b32.xlu1 %v2310_v12, %s2714_s27  ;;  %1133 = vrot.lane.b32.xlu2 %v2310_v12, %s2716_s18 }
 0x54e   : > { %1121 = vrot.lane.b32.xlu0 %v2310_v12, %s2712_s29 }
 0x555   : > { %1115 = vrot.lane.b32.xlu1 %v2310_v12, %s2713_s30  ;;  %1119 = vrot.lane.b32.xlu2 %v2301_v4, %s2712_s29 }
 0x556   : > { %1157 = vrot.lane.b32.xlu0 %v2301_v4, %s2714_s27 }
 0x55d   : > { %1165 = vperm.xlu1 %1747, %v1682_v6   ;;  %1113 = vrot.lane.b32.xlu2 %v2301_v4, %s2713_s30  ;;  %v1690_v6 = vld [vmem:[%s2659_s5 + $0x50] sm:$0xff] }
 0x55e   : > { %1170 = vperm.xlu0 %1746, %v1683_v13  }
 0x58f   : > { %v1146_v11 = vpop.permute.xlu2 %1145 }
 0x590   : > { %v1149_v25 = vmul.f32 %v2041_v24, %v1146_v11 }
 0x597   : > { %v1154_v14 = vpop.permute.xlu2 %1153 }
 0x598   : > { %v1156_v15 = vmul.f32 %v2035_v19, %v1154_v14 }
 0x59a   : > { %1179 = vmatpush.msrb.mxu0 %v1156_v15 }
 0x59f   : > { %v1126_v18 = vpop.permute.xlu2 %1125 }
 0x5a0   : > { %v1129_v44 = vmul.f32 %v2074_v42, %v1126_v18 }
 0x5a7   : > { %v1140_v16 = vpop.permute.xlu1 %1139  ;;  %v1134_v26 = vpop.permute.xlu2 %1133 }
 0x5a8   : > { %v1152_v17 = vpop.permute.xlu0 %1151  ;;  %v1143_v29 = vmul.f32 %v2048_v27, %v1140_v16  ;;  %v1136_v36 = vmul.f32 %v2061_v35, %v1134_v26 }
 0x5a9   : > { %v1155_v20 = vmul.f32 %v2035_v19, %v1152_v17 }
 0x5ab   : > { %1180 = vmatpush.msrb.mxu0 %v1155_v20 }
 0x5af   : > { %v1148_v21 = vpop.permute.xlu1 %1147  ;;  %v1120_v37 = vpop.permute.xlu2 %1119 }
 0x5b0   : > { %v1150_v22 = vmul.f32 %v2041_v24, %v1148_v21  ;;  %v1142_v23 = vpop.permute.xlu0 %1141  ;;  %v1123_v47 = vmul.f32 %v2087_v48, %v1120_v37 }
 0x5b1   : > { %v1144_v28 = vmul.f32 %v2048_v27, %v1142_v23 }
 0x5b2   : > { %1181 = vmatpush.msrb.mxu0 %v1150_v22 }
 0x5b4   : > { %1182 = vmatpush.msrb.mxu0 %v1149_v25 }
 0x5b6   : > { %1183 = vmatpush.msrb.mxu0 %v1144_v28 }
 0x5b7   : > { %v1128_v30 = vpop.permute.xlu1 %1127  ;;  %v1114_v49 = vpop.permute.xlu2 %1113 }
 0x5b8   : > { %v1132_v31 = vpop.permute.xlu0 %1131  ;;  %1184 = vmatpush.msrb.mxu0 %v1143_v29  ;;  %v1130_v40 = vmul.f32 %v2074_v42, %v1128_v30  ;;  %v1117_v55 = vmul.f32 %v2100_v56, %v1114_v49  ;;  %v1689_v49 = vld [vmem:[%s2658_s4 + $0xb8] sm:$0xff] }
 0x5b9   : > { %v1135_v38 = vmul.f32 %v2061_v35, %v1132_v31 }
 0x5ba   : > { %1185 = vmatpush.msrb.mxu0 %v1138_v32 }
 0x5bc   : > { %1186 = vmatpush.msrb.mxu0 %v1137_v34 }
 0x5be   : > { %1187 = vmatpush.msrb.mxu0 %v1136_v36 }
 0x5bf   : > { %v1160_v39 = vpop.permute.xlu1 %1159 }
 0x5c0   : > { %v1162_v41 = vmul.f32 %v2081_v45, %v1160_v39  ;;  %v1122_v43 = vpop.permute.xlu0 %1121  ;;  %1188 = vmatpush.msrb.mxu0 %v1135_v38 }
 0x5c1   : > { %v1124_v46 = vmul.f32 %v2087_v48, %v1122_v43 }
 0x5c2   : > { %1189 = vmatpush.msrb.mxu0 %v1130_v40  ;;  %1216 = vmatpush.msra.mxu2 %v1162_v41 }
 0x5c4   : > { %1190 = vmatpush.msrb.mxu0 %v1129_v44 }
 0x5c6   : > { %1191 = vmatpush.msrb.mxu0 %v1124_v46 }
 0x5c7   : > { %v1116_v50 = vpop.permute.xlu1 %1115 }
 0x5c8   : > { %v1118_v51 = vmul.f32 %v2100_v56, %v1116_v50  ;;  %v1158_v52 = vpop.permute.xlu0 %1157  ;;  %1192 = vmatpush.msrb.mxu0 %v1123_v47  ;;  %v1687_v47 = vld [vmem:[%s2658_s4 + $0xa8] sm:$0xff]  ;;  %v1397_v50 = vld [vmem:[%s2662_s8 + $0x78] sm:$0xff] }
 0x5c9   : > { %v1161_v53 = vmul.f32 %v2081_v45, %v1158_v52  ;;  %v1413_v52 = vld [vmem:[%s2663_s9 + $0x78] sm:$0xff] }
 0x5ca   : > { %1193 = vmatpush.msrb.mxu0 %v1118_v51  ;;  %v1396_v51 = vld [vmem:[%s2662_s8 + $0x70] sm:$0xff] }
 0x5cb   : > { %1217 = vmatpush.msra.mxu2 %v1161_v53  ;;  %v1395_v53 = vld [vmem:[%s2662_s8 + $0x68] sm:$0xff] }
 0x5cc   : > { %1684 = vmatmul.msk.f32.vlgmr.msra.gmra.mxu2 %vm680_vm2, %v1679_v54  ;;  %1194 = vmatpush.msrb.mxu0 %v1117_v55  ;;  %v1412_v54 = vld [vmem:[%s2663_s9 + $0x70] sm:$0xff]  ;;  %v1411_v55 = vld [vmem:[%s2663_s9 + $0x68] sm:$0xff] }
 0x5cd   : > { %1195 = vmatmul.f32.vlgmr.msrb.gmra.mxu0 %v1678_v57  ;;  %v1394_v57 = vld [vmem:[%s2662_s8 + $0x60] sm:$0xff] }
 0x5ce   : > { %1417 = vmatpush.msra.mxu0 %v1413_v52 }
 0x5cf   : > { %v1166_v61 = vpop.permute.xlu1 %1165 }
 0x5d0   : > { %v1171_v3 = vpop.permute.xlu0 %1170  ;;  %1418 = vmatpush.msra.mxu0 %v1412_v54 }
 0x5d2   : > { %1419 = vmatpush.msra.mxu0 %v1411_v55 }
 0x5d4   : > { %1685 = vmatmul.msk.f32.gmra.mxu2 %vm680_vm2, %v1681_v58  ;;  %v1410_v58 = vld [vmem:[%s2663_s9 + $0x60] sm:$0xff] }
 0x5d5   : > { %1198 = vmatmul.f32.gmra.mxu0 %v1680_v59  ;;  %v1393_v59 = vld [vmem:[%s2662_s8 + $0x58] sm:$0xff] }
 0x5d6   : > { %1420 = vmatpush.msra.mxu0 %v1410_v58  ;;  %v1518_v58 = vld [vmem:[%s2667_s13 + $0x28] sm:$0xff] }
 0x64a   : > { %v1196_v60 = vpop.f32.mrf.mxu0 }
 0x64b   : > { %v1197_v62 = vadd.f32 %v1196_v60, %v1166_v61  ;;  %v1409_v60 = vld [vmem:[%s2663_s9 + $0x58] sm:$0xff] }
 0x64c   : > { %1421 = vmatpush.msra.mxu0 %v1409_v60  ;;  %v1516_v60 = vld [vmem:[%s2667_s13 + $0x18] sm:$0xff] }
 0x64f   : > { %v1219_v63 = vpop.f32.mrf.mxu2 }
 0x650   : > { %v1220_v0 = vadd.f32 %v1219_v63, %v1197_v62  ;;  %v1392_v62 = vld [vmem:[%s2662_s8 + $0x50] sm:$0xff] }
 0x651   : > { %v1408_v63 = vld [vmem:[%s2663_s9 + $0x50] sm:$0xff] }
 0x652   : > { %v1225_v1 = vmax.f32 %v1220_v0, 0.0  ;;  %v1199_v2 = vpop.f32.mrf.mxu0  ;;  %v1391_v0 = vld [vmem:[%s2662_s8 + $0x48] sm:$0xff]  ;;  %1422 = vmatpush.msra.mxu0 %v1408_v63  ;;  %v1513_v63 = vld [vmem:[%s2667_s13] sm:$0xff] }
 0x653   : > { %v1200_v5 = vadd.f32 %v1199_v2, %v1171_v3  ;;  %v1390_v2 = vld [vmem:[%s2662_s8 + $0x40] sm:$0xff] }
 0x654   : > { %1267 = vrot.lane.b32.xlu2 %v1225_v1, %s2718_s1  ;;  %1273 = vrot.lane.b32.xlu0 %v1225_v1, %s2719_s25  ;;  %v1259_v30 = vmul.f32 %v2056_v33, %v1225_v1  ;;  %v1406_v3 = vld [vmem:[%s2663_s9 + $0x40] sm:$0xff] }
 0x657   : > { %v1222_v7 = vpop.f32.mrf.mxu2 }
 0x658   : > { %v1223_v8 = vadd.f32 %v1222_v7, %v1200_v5  ;;  %v1389_v7 = vld [vmem:[%s2662_s8 + $0x38] sm:$0xff] }
 0x65a   : > { %v1226_v9 = vmax.f32 %v1223_v8, 0.0  ;;  %v1405_v8 = vld [vmem:[%s2663_s9 + $0x38] sm:$0xff] }
 0x65c   : > { %1269 = vrot.lane.b32.xlu1 %v1226_v9, %s2718_s1  ;;  %1275 = vrot.lane.b32.xlu2 %v1226_v9, %s2719_s25  ;;  %s1780_s1 = scalar_lea.hbm %s1779_s17, 1 }
 0x65d   : > { %1263 = vrot.lane.b32.xlu0 %v1226_v9, %s2715_s28  ;;  %p1781_p11 = scmp.ne.s32.totalorder %s1779_s17, %s1780_s1 }
 0x65f   : > { %p1782_p12 = pnand %p1781_p11, %p1963_p5 }
 0x661   : > { %p1783_p13 = pneg %p1782_p12 }
 0x664   : > { %1261 = vrot.lane.b32.xlu1 %v1225_v1, %s2715_s28  ;;  %1247 = vrot.lane.b32.xlu2 %v1225_v1, %s2717_s20  ;;  %s1784_s28 = scalar_lea.hbm %s2669_s15, 2 }
 0x665   : > { %1253 = vrot.lane.b32.xlu0 %v1225_v1, %s2716_s18  ;;  %p1786_p1 = scmp.lt.s32.totalorder %s1784_s28, %s1780_s1 }
 0x667   : > { %p1787_p2 = por %p1786_p1, %p1785_p0 }
 0x669   : > { %p1788_p3 = pnand %p1787_p2, %p1783_p13 }
 0x66c   : > { %1249 = vrot.lane.b32.xlu1 %v1226_v9, %s2717_s20  ;;  %1255 = vrot.lane.b32.xlu2 %v1226_v9, %s2716_s18  ;;  %s513_s18 = sand.u32 1, %s1818_s24  }
 0x66d   : > { %1243 = vrot.lane.b32.xlu0 %v1226_v9, %s2712_s29  ;;  %s514_s2 = scalar_lea.vmem [#allocation3], %s513_s18 }
 0x66e   : > { %s1565_s3 = sshll.u32 %s514_s2, 4  ;;  %s1566_s3 = int_to_ptr.vmem [resolvable:$true] %s1565_s3 }
 0x674   : > { %1241 = vrot.lane.b32.xlu1 %v1225_v1, %s2712_s29  ;;  %1237 = vrot.lane.b32.xlu2 %v1226_v9, %s2713_s30 }
 0x675   : > { %1235 = vrot.lane.b32.xlu0 %v1225_v1, %s2713_s30 }
 0x67c   : > { %1281 = vrot.lane.b32.xlu1 %v1226_v9, %s2714_s27  ;;  %1279 = vrot.lane.b32.xlu2 %v1225_v1, %s2714_s27  ;;  %v1407_v1 = vld [vmem:[%s2663_s9 + $0x48] sm:$0xff]  ;;  %s526_s27 = scalar_lea.vmem %s2670_s16, %s1978_s21  ;;  %s1552_s21 = scalar_lea.sflag [#allocation4], %s513_s18 }
 0x67d   : > { %1292 = vperm.xlu0 %1746, %v1691_v10   ;;  %1423 = vmatpush.msra.mxu0 %v1407_v1  ;;  %v1404_v10 = vld [vmem:[%s2663_s9 + $0x30] sm:$0xff] }
 0x67f   : > { %1424 = vmatpush.msra.mxu0 %v1406_v3 }
 0x681   : > { %1425 = vmatpush.msra.mxu0 %v1405_v8  ;;  %v1457_v8 = vld [vmem:[%s2664_s10] sm:$0x1] }
 0x683   : > { %1426 = vmatpush.msra.mxu0 %v1404_v10 }
 0x684   : > { %1287 = vperm.xlu1 %1747, %v1690_v6  }
 0x6ae   : > { %v1268_v13 = vpop.permute.xlu2 %1267 }
 0x6af   : > { %v1271_v22 = vmul.f32 %v2041_v24, %v1268_v13 }
 0x6b6   : > { %v1276_v11 = vpop.permute.xlu2 %1275 }
 0x6b7   : > { %v1278_v14 = vmul.f32 %v2035_v19, %v1276_v11  ;;  %v1387_v11 = vld [vmem:[%s2662_s8 + $0x28] sm:$0xff] }
 0x6b9   : > { %1301 = vmatpush.msra.mxu3 %v1278_v14 }
 0x6be   : > { %v1248_v21 = vpop.permute.xlu2 %1247 }
 0x6c6   : > { %v1274_v15 = vpop.permute.xlu0 %1273  ;;  %v1256_v29 = vpop.permute.xlu2 %1255 }
 0x6c7   : > { %v1277_v16 = vmul.f32 %v2035_v19, %v1274_v15  ;;  %v1260_v19 = vmul.f32 %v2056_v33, %v1226_v9  ;;  %v1258_v31 = vmul.f32 %v2061_v35, %v1256_v29  ;;  %v1388_v9 = vld [vmem:[%s2662_s8 + $0x30] sm:$0xff]  ;;  %v1403_v15 = vld [vmem:[%s2663_s9 + $0x28] sm:$0xff] }
 0x6c8   : > { %1427 = vmatpush.msra.mxu0 %v1403_v15  ;;  %v1521_v15 = vld [vmem:[#allocation2] sm:$0x1] }
 0x6c9   : > { %1302 = vmatpush.msra.mxu3 %v1277_v16 }
 0x6ce   : > { %v1270_v17 = vpop.permute.xlu1 %1269  ;;  %v1238_v37 = vpop.permute.xlu2 %1237 }
 0x6cf   : > { %v1272_v18 = vmul.f32 %v2041_v24, %v1270_v17  ;;  %v1264_v20 = vpop.permute.xlu0 %1263  ;;  %v1240_v41 = vmul.f32 %v2100_v56, %v1238_v37  ;;  %v1386_v17 = vld [vmem:[%s2662_s8 + $0x20] sm:$0xff]  ;;  %v1480_v37 = vld [vmem:[%s2665_s11 + $0x38] sm:$0xff] }
 0x6d0   : > { %v1266_v23 = vmul.f32 %v2048_v27, %v1264_v20 }
 0x6d1   : > { %1303 = vmatpush.msra.mxu3 %v1272_v18 }
 0x6d3   : > { %1304 = vmatpush.msra.mxu3 %v1271_v22  ;;  %v1385_v22 = vld [vmem:[%s2662_s8 + $0x18] sm:$0xff] }
 0x6d5   : > { %1305 = vmatpush.msra.mxu3 %v1266_v23 }
 0x6d6   : > { %v1262_v25 = vpop.permute.xlu1 %1261  ;;  %v1280_v43 = vpop.permute.xlu2 %1279 }
 0x6d7   : > { %v1265_v26 = vmul.f32 %v2048_v27, %v1262_v25  ;;  %v1254_v28 = vpop.permute.xlu0 %1253  ;;  %v1251_v27 = vmul.f32 %v2074_v42, %v1248_v21  ;;  %v1384_v25 = vld [vmem:[%s2662_s8 + $0x10] sm:$0xff] }
 0x6d8   : > { %v1257_v32 = vmul.f32 %v2061_v35, %v1254_v28 }
 0x6d9   : > { %1306 = vmatpush.msra.mxu3 %v1265_v26 }
 0x6db   : > { %1307 = vmatpush.msra.mxu3 %v1260_v19 }
 0x6dd   : > { %1308 = vmatpush.msra.mxu3 %v1259_v30  ;;  %v1351_v30 = vld [vmem:[%s2660_s6] sm:$0x7] }
 0x6de   : > { %v1250_v24 = vpop.permute.xlu1 %1249 }
 0x6df   : > { %v1244_v34 = vpop.permute.xlu0 %1243  ;;  %1309 = vmatpush.msra.mxu3 %v1258_v31  ;;  %v1252_v36 = vmul.f32 %v2074_v42, %v1250_v24  ;;  %v1686_v42 = vld [vmem:[%s2658_s4 + $0xa0] sm:$0xff]  ;;  %v1488_v31 = vld [vmem:[%s2665_s11 + $0x78] sm:$0xff] }
 0x6e0   : > { %v1246_v38 = vmul.f32 %v2087_v48, %v1244_v34  ;;  %v1485_v24 = vld [vmem:[%s2665_s11 + $0x60] sm:$0xff]  ;;  %v1483_v34 = vld [vmem:[%s2665_s11 + $0x50] sm:$0xff] }
 0x6e1   : > { %1310 = vmatpush.msra.mxu3 %v1257_v32  ;;  %v1484_v32 = vld [vmem:[%s2665_s11 + $0x58] sm:$0xff] }
 0x6e3   : > { %1311 = vmatpush.msra.mxu3 %v1252_v36  ;;  %v1482_v36 = vld [vmem:[%s2665_s11 + $0x48] sm:$0xff] }
 0x6e5   : > { %1312 = vmatpush.msra.mxu3 %v1251_v27  ;;  %v1481_v27 = vld [vmem:[%s2665_s11 + $0x40] sm:$0xff] }
 0x6e6   : > { %v1242_v39 = vpop.permute.xlu1 %1241 }
 0x6e7   : > { %v1245_v33 = vmul.f32 %v2087_v48, %v1242_v39  ;;  %1313 = vmatpush.msra.mxu3 %v1246_v38  ;;  %v1236_v40 = vpop.permute.xlu0 %1235  ;;  %v1283_v48 = vmul.f32 %v2081_v45, %v1280_v43  ;;  %v1479_v38 = vld [vmem:[%s2665_s11 + $0x30] sm:$0xff]  ;;  %v1478_v39 = vld [vmem:[%s2665_s11 + $0x28] sm:$0xff] }
 0x6e8   : > { %v1239_v35 = vmul.f32 %v2100_v56, %v1236_v40  ;;  %v1688_v56 = vld [vmem:[%s2658_s4 + $0xb0] sm:$0xff]  ;;  %v1477_v40 = vld [vmem:[%s2665_s11 + $0x20] sm:$0xff] }
 0x6e9   : > { %1314 = vmatpush.msra.mxu3 %v1245_v33  ;;  %v1402_v33 = vld [vmem:[%s2663_s9 + $0x20] sm:$0xff]  ;;  %v1400_v43 = vld [vmem:[%s2663_s9 + $0x10] sm:$0xff] }
 0x6ea   : > { %1428 = vmatpush.msra.mxu0 %v1402_v33 }
 0x6eb   : > { %1315 = vmatpush.msra.mxu3 %v1240_v41  ;;  %v1401_v41 = vld [vmem:[%s2663_s9 + $0x18] sm:$0xff] }
 0x6ec   : > { %1429 = vmatpush.msra.mxu0 %v1401_v41 }
 0x6ed   : > { %1316 = vmatpush.msra.mxu3 %v1239_v35  ;;  %v1476_v35 = vld [vmem:[%s2665_s11 + $0x18] sm:$0xff] }
 0x6ee   : > { %v1282_v44 = vpop.permute.xlu1 %1281  ;;  %1317 = vmatmul.f32.vlgmr.msra.gmra.mxu3 %v1686_v42  ;;  %v1383_v42 = vld [vmem:[%s2662_s8 + $0x8] sm:$0xff]  ;;  %1430 = vmatpush.msra.mxu0 %v1400_v43 }
 0x6ef   : > { %v1284_v46 = vmul.f32 %v2081_v45, %v1282_v44  ;;  %v1352_v45 = vld [vmem:[%s2661_s7] sm:$0x7]  ;;  %v1293_v16 = vpop.permute.xlu0 %1292  ;;  %v1475_v44 = vld [vmem:[%s2665_s11 + $0x10] sm:$0xff] }
 0x6f0   : > { %1355 = vperm.xlu2 %1748, %v1352_v45   ;;  %v1520_v45 = vld [vmem:[%s2667_s13 + $0x38] sm:$0xff] }
 0x6f1   : > { %1338 = vmatpush.msrb.mxu2 %v1284_v46  ;;  %v1382_v46 = vld [vmem:[%s2662_s8] sm:$0xff]  ;;  %1534 = vmatpush.msrb.mxu3 %v1520_v45 }
 0x6f3   : > { %1339 = vmatpush.msrb.mxu2 %v1283_v48  ;;  %v1399_v48 = vld [vmem:[%s2663_s9 + $0x8] sm:$0xff] }
 0x6f4   : > { %1692 = vmatmul.msk.f32.vlgmr.msrb.gmra.mxu2 %vm680_vm2, %v1687_v47  ;;  %v1474_v47 = vld [vmem:[%s2665_s11 + $0x8] sm:$0xff]  ;;  %1431 = vmatpush.msra.mxu0 %v1399_v48 }
 0x6f5   : > { %1437 = vmatpush.msra.mxu2 %v1397_v50 }
 0x6f6   : > { %1320 = vmatmul.f32.gmra.mxu3 %v1688_v56  ;;  %v1288_v6 = vpop.permute.xlu1 %1287  ;;  %v1398_v56 = vld [vmem:[%s2663_s9] sm:$0xff] }
 0x6f7   : > { %1438 = vmatpush.msra.mxu2 %v1396_v51  ;;  %1432 = vmatpush.msra.mxu0 %v1398_v56 }
 0x6f9   : > { %1439 = vmatpush.msra.mxu2 %v1395_v53 }
 0x6fb   : > { %1440 = vmatpush.msra.mxu2 %v1394_v57  ;;  %v1519_v57 = vld [vmem:[%s2667_s13 + $0x30] sm:$0xff] }
 0x6fc   : > { %1693 = vmatmul.msk.f32.gmra.mxu2 %vm680_vm2, %v1689_v49  ;;  %v1473_v49 = vld [vmem:[%s2665_s11] sm:$0xff]  ;;  %1535 = vmatpush.msrb.mxu3 %v1519_v57 }
 0x6fd   : > { %1441 = vmatpush.msra.mxu2 %v1393_v59  ;;  %v1517_v59 = vld [vmem:[%s2667_s13 + $0x20] sm:$0xff] }
 0x6fe   : > { %1536 = vmatpush.msrb.mxu3 %v1518_v58 }
 0x6ff   : > { %1442 = vmatpush.msra.mxu2 %v1392_v62  ;;  %v1514_v62 = vld [vmem:[%s2667_s13 + $0x8] sm:$0xff] }
 0x700   : > { %1537 = vmatpush.msrb.mxu3 %v1517_v59 }
 0x701   : > { %1443 = vmatpush.msra.mxu2 %v1391_v0  ;;  %v1489_v0 = vld [vmem:[%s2666_s12] sm:$0x1] }
 0x702   : > { %1538 = vmatpush.msrb.mxu3 %v1516_v60 }
 0x703   : > { %1444 = vmatpush.msra.mxu2 %v1390_v2 }
 0x705   : > { %1445 = vmatpush.msra.mxu2 %v1389_v7 }
 0x707   : > { %1446 = vmatpush.msra.mxu2 %v1388_v9 }
 0x709   : > { %1447 = vmatpush.msra.mxu2 %v1387_v11 }
 0x70b   : > { %1448 = vmatpush.msra.mxu2 %v1386_v17 }
 0x70d   : > { %1449 = vmatpush.msra.mxu2 %v1385_v22 }
 0x70f   : > { %1450 = vmatpush.msra.mxu2 %v1384_v25 }
 0x711   : > { %1451 = vmatpush.msra.mxu2 %v1383_v42 }
 0x713   : > { %1452 = vmatpush.msra.mxu2 %v1382_v46 }
 0x74a   : > { %v1356_v50 = vpop.permute.xlu2 %1355 }
 0x771   : > { %v1318_v61 = vpop.f32.mrf.mxu3 }
 0x772   : > { %v1319_v14 = vadd.f32 %v1318_v61, %v1288_v6  ;;  %v1515_v61 = vld [vmem:[%s2667_s13 + $0x10] sm:$0xff] }
 0x773   : > { %1539 = vmatpush.msrb.mxu3 %v1515_v61 }
 0x775   : > { %1540 = vmatpush.msrb.mxu3 %v1514_v62 }
 0x777   : > { %v1341_v5 = vpop.f32.mrf.mxu2  ;;  %1541 = vmatpush.msrb.mxu3 %v1513_v63 }
 0x778   : > { %v1342_v18 = vadd.f32 %v1341_v5, %v1319_v14 }
 0x779   : > { %v1321_v13 = vpop.f32.mrf.mxu3 }
 0x77a   : > { %v1322_v20 = vadd.f32 %v1321_v13, %v1293_v16  ;;  %v1347_v26 = vadd.f32 %v1342_v18, %v2301_v4  ;;  %v1487_v4 = vld [vmem:[%s2665_s11 + $0x70] sm:$0xff] }
 0x77c   : > { %v1349_v29 = vmax.f32 %v1347_v26, 0.0 }
 0x77f   : > { %v1344_v21 = vpop.f32.mrf.mxu2 }
 0x780   : > { %v1345_v23 = vadd.f32 %v1344_v21, %v1322_v20 }
 0x782   : > { %v1348_v28 = vadd.f32 %v1345_v23, %v2310_v12  ;;  %v1486_v12 = vld [vmem:[%s2665_s11 + $0x68] sm:$0xff] }
 0x784   : > { %v1350_v19 = vmax.f32 %v1348_v28, 0.0 }
 0x786   : > { %1375 = vmatpush.msra.mxu1 %v1350_v19 }
 0x788   : > { %1376 = vmatpush.msra.mxu1 %v1349_v29 }
 0x789   : > { %1694 = vmatmul.msk.f32.vlgmr.msra.gmra.mxu1 %vm680_vm2, %v1351_v30 }
 0x78a   : > { %1492 = vmatpush.msrb.mxu1 %v1488_v31 }
 0x78c   : > { %1493 = vmatpush.msrb.mxu1 %v1487_v4 }
 0x78e   : > { %1494 = vmatpush.msrb.mxu1 %v1486_v12 }
 0x790   : > { %1495 = vmatpush.msrb.mxu1 %v1485_v24 }
 0x792   : > { %1496 = vmatpush.msrb.mxu1 %v1484_v32 }
 0x794   : > { %1497 = vmatpush.msrb.mxu1 %v1483_v34 }
 0x796   : > { %1498 = vmatpush.msrb.mxu1 %v1482_v36 }
 0x798   : > { %1499 = vmatpush.msrb.mxu1 %v1481_v27 }
 0x79a   : > { %1500 = vmatpush.msrb.mxu1 %v1480_v37 }
 0x79c   : > { %1501 = vmatpush.msrb.mxu1 %v1479_v38 }
 0x79e   : > { %1502 = vmatpush.msrb.mxu1 %v1478_v39 }
 0x7a0   : > { %1503 = vmatpush.msrb.mxu1 %v1477_v40 }
 0x7a2   : > { %1504 = vmatpush.msrb.mxu1 %v1476_v35 }
 0x7a4   : > { %1505 = vmatpush.msrb.mxu1 %v1475_v44 }
 0x7a6   : > { %1506 = vmatpush.msrb.mxu1 %v1474_v47 }
 0x7a8   : > { %1507 = vmatpush.msrb.mxu1 %v1473_v49 }
 0x806   : > { %v1378_v51 = vpop.f32.mrf.mxu1 }
 0x807   : > { %v1379_v52 = vadd.f32 %v1378_v51, %v1356_v50 }
 0x809   : > { %v1381_v53 = vmax.f32 %v1379_v52, 0.0 }
 0x80b   : > { %v1415_v54 = vrot.slane %v1381_v53, 1  ;;  %v1490_v55 = vrot.slane %v1381_v53, 2  ;;  %1453 = vmatmul.f32.vlgmr.msra.gmra.mxu2 %v1381_v53 }
 0x80d   : > { %1433 = vmatmul.f32.vlgmr.msra.gmra.mxu0 %v1415_v54  ;;  %1508 = vmatmul.f32.vlgmr.msrb.gmra.mxu1 %v1490_v55 }
 0x88a   : > { %v1509_v1 = vpop.f32.mrf.mxu1  ;;  %v1434_v5 = vpop.f32.mrf.mxu0 }
 0x88b   : > { %v1510_v2 = vadd.f32 %v1509_v1, %v1489_v0 }
 0x88d   : > { %v1512_v3 = vmax.f32 %v1510_v2, 0.0 }
 0x88e   : > { %v1454_v7 = vpop.f32.mrf.mxu2 }
 0x88f   : > { %v1455_v9 = vadd.f32 %v1454_v7, %v1434_v5  ;;  %1695 = vmatmul.msk.f32.vlgmr.msrb.gmra.mxu3 %vm1522_vm3, %v1512_v3 }
 0x891   : > { %v1458_v10 = vadd.f32 %v1457_v8, %v1455_v9 }
 0x893   : > { %v1460_v6 = vsel %vm1459_vm4, %v1458_v10, -inf }
 0x894   : > { %1461 = vmax.xlane.f32.xlu0 %v1460_v6 }
 0x907   : > { %v1462_v13 = vpop.xlane.xlu0 %1461 }
 0x908   : > { %v1463_v11 = vsub.f32 %v1458_v10, %v1462_v13 }
 0x90a   : > { %v1464_v14 = vmul.f32 1.442695, %v1463_v11 }
 0x90c   : > { %1758 = vpow2.f32 %v1464_v14 }
 0x912   : > { %v1759_v16 = vpop.eup %1758  ;;  %v1543_v17 = vpop.f32.mrf.mxu3 }
 0x913   : > { %v1466_v18 = vsel %vm1459_vm4, %v1759_v16, 0.0  ;;  %v1544_v20 = vadd.f32 %v1543_v17, %v1521_v15 }
 0x914   : > { %1467 = vadd.xlane.f32.xlu1 %v1466_v18 }
 0x915   : > { %1760 = vtanh.f32 %v1544_v20 }
 0x91b   : > { %v1761_v21 = vpop.eup %1760 }
 0x91c   : > { %v1547_v22 = vadd.f32 1.0, %v1761_v21 }
 0x91e   : > { %v1548_v23 = vmul.f32 0.5, %v1547_v22 }
 0x920   : > { %1550 = vst.msk [vmem:[%s526_s27] sm:$0x1] %vm1549_vm5, %v1548_v23 }
 0x987   : > { %v1468_v25 = vpop.xlane.xlu1 %1467 }
 0x988   : > { %1762 = vlog2.f32 %v1468_v25 }
 0x98e   : > { %v1763_v26 = vpop.eup %1762 }
 0x98f   : > { %v1470_v28 = vmul.f32 0.6931472, %v1763_v26 }
 0x991   : > { %v1471_v19 = vsub.f32 %v1463_v11, %v1470_v28 }
 0x993   : > { %1472 = vst.msk [vmem:[%s514_s2] sm:$0x1] %vm1459_vm4, %v1471_v19 }
 0x994   : > { %1791 = shalt.err (!%p1788_p3)
}
 0x995   : > { %1698 = dma.vmem_to_hbm [thread:$0]  (%p1963_p5), %s1566_s3, 16, %s1568_s26, %s1552_s21  }
 0x996 PF: > { %s2721_s30 = sld [smem:[#allocation8_spill]] }
 0x997   : > { %s2722_s27 = sld [smem:[#allocation6_spill]] }
 0x99c   : > { %p1704_p4 = scmp.ge.s32.totalorder %s2721_s30, 2 }
 0x99d   : > { %s1582_s23 = sand.u32 1, %s2722_s27  }
 0x99e   : > { %p1701_p7 = pnand %p1704_p4, %p1967_p6  ;;  %s1583_s22 = scalar_lea.sflag [#allocation4], %s1582_s23 }
 0x9a0   : > { %p1702_p8 = pneg %p1701_p7 }
 0x9a2   : > { %1809 = dma.done.wait (%p1702_p8), %s1583_s22, 16  }
 0x9a3   : > { %1811 = vsyncadd (%p1702_p8), %s1583_s22, 4294967280  ;;  %s2724_s26 = sld [smem:[#allocation9_spill]]  ;;  %s2727_s23 = smov %s1818_s24 }
 0x9a4   : > { %s2725_s19 = sld [smem:[#allocation7_spill]] }
 0x9a5   : > { %s2726_s25 = sld [smem:[#allocation10_spill]] }
 0x9a9   : > { %p29_p9 = scmp.ge.s32.totalorder %s2724_s26, 4  }
 0x9aa   : > { %s2728_s24 = smov %s2725_s19 }
 0x9ab   :  { %31 = sbr.rel (!%p29_p9) target bundleno = 8 (0x8), region = 137 }
 0x9b0   :  { %1594 = vsyncpa [#allocation4], 1 }
 0x9b1   :  { %1596 = vsyncpa [#allocation4 + $0x1], 1 }

</bundles_post_ra>
